<compile_context>
chip_gen: v6e
topology: v6e:2x2x1
jax: 0.10.0
libtpu: 0.0.40
codegen_flags: <defaults>
</compile_context>

<pallas_src>
import functools

import jax
import jax.numpy as jnp
from jax.experimental import pallas as pl
from jax.experimental.pallas import tpu as pltpu


# Safe scoped-VMEM limit on every generation (v5e/v6e: 128 MiB phys, v7x: 64 MiB).
_VMEM_LIMIT_BYTES = 32 * 1024 * 1024


def _round_up(x, m):
    return (x + m - 1) // m * m


# ------------------- fused encoder kernel (conv+bias+ReLU+pool) -------------------

def _encoder_fused_kernel(x00_ref, x01_ref, x10_ref, x11_ref, w_ref, b_ref,
                          o_ref, *, H2, W2, cin):
    """One batch image: 3x3 conv (pad=1) + bias + ReLU + 2x2 max-pool.

    x??_ref: (1, H/2+1, W/2+1, cin) bf16 parity planes of the zero-padded image.
    w_ref:   (9, cin, Cenc) bf16 tap-major weights.
    b_ref:   (1, Cenc) f32 bias.
    o_ref:   (1, H2*W2, Cenc) bf16 pooled features.
    """
    cenc = w_ref.shape[2]
    planes = ((x00_ref[0], x01_ref[0]), (x10_ref[0], x11_ref[0]))  # [row parity][col parity]
    w_taps = [w_ref[t] for t in range(9)]                          # (cin, cenc) bf16 each

    pooled = None
    for di in (0, 1):                 # pooling-branch row offset
        for dj in (0, 1):             # pooling-branch col offset
            acc = jnp.zeros((H2 * W2, cenc), jnp.float32)
            for kh in range(3):
                for kw in range(3):
                    p, rs = (di + kh) & 1, (di + kh) >> 1
                    q, cs = (dj + kw) & 1, (dj + kw) >> 1
                    patch = planes[p][q][rs:rs + H2, cs:cs + W2, :]   # (H2, W2, cin)
                    patch = patch.reshape(H2 * W2, cin)               # contiguous, no stride
                    acc = acc + jnp.dot(patch, w_taps[kh * 3 + kw],
                                        preferred_element_type=jnp.float32)
            pooled = acc if pooled is None else jnp.maximum(pooled, acc)

    # bias-add and ReLU commute with the max over the 4 pooling branches.
    y = jnp.maximum(pooled + b_ref[...], 0.0)
    o_ref[0] = y.astype(o_ref.dtype)


# ------------------- generic (M,K)@(K,N)+b kernel (decoder 1x1 conv) ----------------

def _matmul_bias_act_kernel(x_ref, w_ref, b_ref, o_ref, *, activation):
    y = jnp.dot(x_ref[...].astype(jnp.bfloat16), w_ref[...],
                preferred_element_type=jnp.float32)
    y = y + b_ref[...]
    if activation == 'relu':
        y = jnp.maximum(y, 0.0)
    elif activation == 'sigmoid':          # fused predict() epilogue (EUP slot)
        y = jax.nn.sigmoid(y)
    o_ref[...] = y.astype(o_ref.dtype)


def matmul_bias_act(x, w, b, *, activation=None, tile_m=512, out_dtype=jnp.float32):
    """out = act(x @ w + b).  x:(M,K), w:(K,Cout), b:(Cout,) -> (M,Cout) out_dtype.

    Output lane dim is padded to a multiple of 128 inside the kernel (unmasked
    stores); M is padded to the tile size (no divisibility requirement).
    """
    M, K = x.shape
    Kw, Cout = w.shape
    assert K == Kw, (x.shape, w.shape)

    n_pad = _round_up(Cout, 128)
    if n_pad != Cout:
        w = jnp.pad(w, ((0, 0), (0, n_pad - Cout)))
        b = jnp.pad(b, (0, n_pad - Cout))

    tile_m = int(min(tile_m, _round_up(M, 8)))
    m_pad = _round_up(M, tile_m)
    if m_pad != M:
        x = jnp.pad(x, ((0, m_pad - M), (0, 0)))

    kernel = functools.partial(_matmul_bias_act_kernel, activation=activation)
    out = pl.pallas_call(
        kernel,
        out_shape=jax.ShapeDtypeStruct((m_pad, n_pad), out_dtype),
        grid_spec=pltpu.PrefetchScalarGridSpec(
            num_scalar_prefetch=0,
            grid=(m_pad // tile_m,),
            in_specs=[
                pl.BlockSpec((tile_m, K), lambda i: (i, 0)),    # activation tile (bf16)
                pl.BlockSpec((K, n_pad), lambda i: (0, 0)),     # full weight (bf16)
                pl.BlockSpec((1, n_pad), lambda i: (0, 0)),     # bias row (f32)
            ],
            out_specs=pl.BlockSpec((tile_m, n_pad), lambda i: (i, 0)),
        ),
        compiler_params=pltpu.CompilerParams(
            dimension_semantics=("parallel",),
            vmem_limit_bytes=_VMEM_LIMIT_BYTES),
    )(x.astype(jnp.bfloat16), w.astype(jnp.bfloat16),
      b.reshape(1, n_pad).astype(jnp.float32))

    if m_pad != M or n_pad != Cout:
        out = out[:M, :Cout]
    return out


# ------------------------------- encoder / decoder ---------------------------------

class Encoder:
    """3x3 conv (pad=1) + ReLU + 2x2 max-pool, fused in one Pallas kernel.

    NHWC in / NHWC out: (N,H,W,Cin) -> (N,H/2,W/2,Cenc) bf16.
    """

    def __init__(self, w, b):
        # w: (3, 3, Cin, Cenc) f32, b: (Cenc,) f32
        _, _, cin, cenc = w.shape
        self.cin = cin
        self.cin_pad = _round_up(cin, 8)                       # align K to sublanes
        wp = jnp.pad(w, ((0, 0), (0, 0), (0, self.cin_pad - cin), (0, 0)))
        self.w = wp.reshape(9, self.cin_pad, cenc).astype(jnp.bfloat16)
        self.b = jnp.asarray(b, jnp.float32).reshape(1, cenc)
        self.cenc = cenc

    def __call__(self, x_nhwc):
        N, H, W, C = x_nhwc.shape
        assert C == self.cin and H % 2 == 0 and W % 2 == 0, (x_nhwc.shape,)
        H2, W2 = H // 2, W // 2

        # zero-pad (conv halo + channel alignment), cast to bf16, split into the
        # four (row parity, col parity) planes: one cheap XLA pass, ~input-sized.
        xp = jnp.pad(x_nhwc, ((0, 0), (1, 1), (1, 1), (0, self.cin_pad - C)))
        xp = xp.astype(jnp.bfloat16)
        planes = [xp[:, p::2, q::2, :] for p in (0, 1) for q in (0, 1)]
        hh, wh = planes[0].shape[1], planes[0].shape[2]        # = H/2+1, W/2+1

        kernel = functools.partial(_encoder_fused_kernel,
                                   H2=H2, W2=W2, cin=self.cin_pad)
        plane_spec = pl.BlockSpec((1, hh, wh, self.cin_pad), lambda n: (n, 0, 0, 0))

        out = pl.pallas_call(
            kernel,
            out_shape=jax.ShapeDtypeStruct((N, H2 * W2, self.cenc), jnp.bfloat16),
            grid_spec=pltpu.PrefetchScalarGridSpec(
                num_scalar_prefetch=0,
                grid=(N,),
                in_specs=[plane_spec, plane_spec, plane_spec, plane_spec,
                          pl.BlockSpec((9, self.cin_pad, self.cenc),
                                       lambda n: (0, 0, 0)),
                          pl.BlockSpec((1, self.cenc), lambda n: (0, 0))],
                out_specs=pl.BlockSpec((1, H2 * W2, self.cenc), lambda n: (n, 0, 0)),
            ),
            compiler_params=pltpu.CompilerParams(
                dimension_semantics=("parallel",),
                vmem_limit_bytes=_VMEM_LIMIT_BYTES),
        )(planes[0], planes[1], planes[2], planes[3], self.w, self.b)

        return out.reshape(N, H2, W2, self.cenc)


class Decoder:
    """1x1 conv (Pallas matmul) commuted BEFORE nearest upsample to image_size.

    NHWC features in -> NCHW output (N, Cout, H, W) f32.
    """

    def __init__(self, w, b):
        # w: (Cenc, Cout) f32, b: (Cout,) f32
        self.w = jnp.asarray(w, jnp.float32)
        self.b = jnp.asarray(b, jnp.float32)
        self.cout = w.shape[1]

    def __call__(self, feats_nhwc, image_size, fused_activation=None):
        N, h, w_, cenc = feats_nhwc.shape
        H, W = image_size
        assert H % h == 0 and W % w_ == 0, (feats_nhwc.shape, image_size)

        # 1x1 conv on the LOW-RES features (4x fewer FLOPs / bytes than after
        # upsampling; nearest upsample and a 1x1 conv commute exactly).
        y = matmul_bias_act(feats_nhwc.reshape(N * h * w_, cenc), self.w, self.b,
                            activation=fused_activation)        # (M, Cout) f32
        y = y.reshape(N, h, w_, self.cout)
        y = jnp.transpose(y, (0, 3, 1, 2))                      # NCHW at low res (tiny)
        y = jnp.repeat(y, H // h, axis=2)
        y = jnp.repeat(y, W // w_, axis=3)
        return y                                                # (N, Cout, H, W)


class EncoderDecoder:
    """JAX/Pallas mirror of the PyTorch EncoderDecoder wrapper (NCHW interface)."""

    def __init__(self, encoder, decoder, activation=None):
        self.encoder = encoder
        self.decoder = decoder
        self._fuse_sigmoid = (activation == 'sigmoid')
        if callable(activation) or activation is None:
            self.activation = activation
        elif activation == 'softmax':
            # NOTE: original PyTorch code has `==` here (a no-op bug); we keep a
            # working softmax over the channel axis for the predict() path.
            self.activation = lambda x: jax.nn.softmax(x, axis=1)
        elif activation == 'sigmoid':
            self.activation = jax.nn.sigmoid
        else:
            raise ValueError('Activation should be "sigmoid", "softmax", callable, None')

    def _run(self, x_nchw, fused_activation=None):
        image_size = x_nchw.shape[-2:]
        x = jnp.transpose(x_nchw, (0, 2, 3, 1))      # NCHW -> NHWC once (Cin tiny)
        x = self.encoder(x)
        return self.decoder(x, image_size, fused_activation=fused_activation)

    def forward(self, x_nchw):
        return self._run(x_nchw)

    def predict(self, x_nchw):
        if self._fuse_sigmoid:
            # sigmoid runs in the decoder kernel epilogue (EUP slot, ~free).
            return self._run(x_nchw, fused_activation='sigmoid')
        x = self.forward(x_nchw)
        if self.activation:
            x = self.activation(x)
        return x


# --------------------------------- reference (pure JAX) -----------------------------

def _reference_forward(x_nchw, w_enc, b_enc, w_dec, b_dec):
    x = jnp.transpose(x_nchw, (0, 2, 3, 1))
    N, H, W, _ = x.shape
    xp = jnp.pad(x, ((0, 0), (1, 1), (1, 1), (0, 0)))
    conv = jnp.zeros((N, H, W, w_enc.shape[3]), jnp.float32)
    for kh in range(3):
        for kw in range(3):
            conv = conv + jnp.einsum('nhwc,co->nhwo',
                                     xp[:, kh:kh + H, kw:kw + W, :], w_enc[kh, kw])
    conv = jnp.maximum(conv + b_enc, 0.0)
    pooled = jnp.max(conv.reshape(N, H // 2, 2, W // 2, 2, -1), axis=(2, 4))
    up = jnp.repeat(jnp.repeat(pooled, 2, axis=1), 2, axis=2)
    y = jnp.einsum('nhwe,eo->nhwo', up, w_dec) + b_dec
    return jnp.transpose(y, (0, 3, 1, 2))


# --------------------------------------- main ---------------------------------------

if __name__ == "__main__":
    N, Cin, H, W = 2, 4, 16, 16
    Cenc, Cout = 32, 3

    key = jax.random.PRNGKey(0)
    kx, kwe, kbe, kwd, kbd = jax.random.split(key, 5)

    x = jax.random.normal(kx, (N, Cin, H, W), dtype=jnp.float32)
    w_enc = 0.1 * jax.random.normal(kwe, (3, 3, Cin, Cenc), dtype=jnp.float32)
    b_enc = 0.1 * jax.random.normal(kbe, (Cenc,), dtype=jnp.float32)
    w_dec = 0.1 * jax.random.normal(kwd, (Cenc, Cout), dtype=jnp.float32)
    b_dec = 0.1 * jax.random.normal(kbd, (Cout,), dtype=jnp.float32)

    model = EncoderDecoder(Encoder(w_enc, b_enc), Decoder(w_dec, b_dec),
                           activation=None)

    fwd = jax.jit(model.forward)
    out = fwd(x)
    jax.block_until_ready(out)
    assert out.shape == (N, Cout, H, W), out.shape

    # numeric sanity check vs. pure-JAX f32 reference (bf16 MXU -> loose tol)
    ref = _reference_forward(x, w_enc, b_enc, w_dec, b_dec)
    max_err = float(jnp.max(jnp.abs(out - ref)))
    assert max_err < 0.1, f"max abs err {max_err}"

    print("KERNEL_OK")
</pallas_src>

<mosaic_0001>
module attributes {stable_mosaic.version = 11 : i64} {
  func.func @_encoder_fused_kernel(%arg0: i32, %arg1: memref<1x9x9x8xbf16, #tpu.memory_space<vmem>>, %arg2: memref<1x9x9x8xbf16, #tpu.memory_space<vmem>>, %arg3: memref<1x9x9x8xbf16, #tpu.memory_space<vmem>>, %arg4: memref<1x9x9x8xbf16, #tpu.memory_space<vmem>>, %arg5: memref<9x8x32xbf16, #tpu.memory_space<vmem>>, %arg6: memref<1x32xf32, #tpu.memory_space<vmem>>, %arg7: memref<1x64x32xbf16, #tpu.memory_space<vmem>>) attributes {dimension_semantics = [#tpu.dimension_semantics<parallel>], iteration_bounds = array<i64: 2>, scalar_prefetch = 0 : i64, scratch_operands = 0 : i64, tpu.core_type = #tpu.core_type<tc>, window_params = [{transform_indices = @transform_0, window_bounds = array<i64: 1, 9, 9, 8>}, {transform_indices = @transform_1, window_bounds = array<i64: 1, 9, 9, 8>}, {transform_indices = @transform_2, window_bounds = array<i64: 1, 9, 9, 8>}, {transform_indices = @transform_3, window_bounds = array<i64: 1, 9, 9, 8>}, {pipeline_mode = #tpu.pipeline_mode<synchronous>, transform_indices = @transform_4, window_bounds = array<i64: 9, 8, 32>}, {pipeline_mode = #tpu.pipeline_mode<synchronous>, transform_indices = @transform_5, window_bounds = array<i64: 1, 32>}, {transform_indices = @transform_6, window_bounds = array<i64: 1, 64, 32>}]} {
    %c0 = arith.constant 0 : index
    %c0_0 = arith.constant 0 : index
    %c0_1 = arith.constant 0 : index
    %c0_2 = arith.constant 0 : index
    %0 = vector.load %arg1[%c0, %c0_0, %c0_1, %c0_2] : memref<1x9x9x8xbf16, #tpu.memory_space<vmem>>, vector<1x9x9x8xbf16>
    %1 = vector.shape_cast %0 : vector<1x9x9x8xbf16> to vector<9x9x8xbf16>
    %c0_3 = arith.constant 0 : index
    %c0_4 = arith.constant 0 : index
    %c0_5 = arith.constant 0 : index
    %c0_6 = arith.constant 0 : index
    %2 = vector.load %arg2[%c0_3, %c0_4, %c0_5, %c0_6] : memref<1x9x9x8xbf16, #tpu.memory_space<vmem>>, vector<1x9x9x8xbf16>
    %3 = vector.shape_cast %2 : vector<1x9x9x8xbf16> to vector<9x9x8xbf16>
    %c0_7 = arith.constant 0 : index
    %c0_8 = arith.constant 0 : index
    %c0_9 = arith.constant 0 : index
    %c0_10 = arith.constant 0 : index
    %4 = vector.load %arg3[%c0_7, %c0_8, %c0_9, %c0_10] : memref<1x9x9x8xbf16, #tpu.memory_space<vmem>>, vector<1x9x9x8xbf16>
    %5 = vector.shape_cast %4 : vector<1x9x9x8xbf16> to vector<9x9x8xbf16>
    %c0_11 = arith.constant 0 : index
    %c0_12 = arith.constant 0 : index
    %c0_13 = arith.constant 0 : index
    %c0_14 = arith.constant 0 : index
    %6 = vector.load %arg4[%c0_11, %c0_12, %c0_13, %c0_14] : memref<1x9x9x8xbf16, #tpu.memory_space<vmem>>, vector<1x9x9x8xbf16>
    %7 = vector.shape_cast %6 : vector<1x9x9x8xbf16> to vector<9x9x8xbf16>
    %c0_15 = arith.constant 0 : index
    %c0_16 = arith.constant 0 : index
    %c0_17 = arith.constant 0 : index
    %8 = vector.load %arg5[%c0_15, %c0_16, %c0_17] : memref<9x8x32xbf16, #tpu.memory_space<vmem>>, vector<1x8x32xbf16>
    %9 = vector.shape_cast %8 : vector<1x8x32xbf16> to vector<8x32xbf16>
    %c1 = arith.constant 1 : index
    %c0_18 = arith.constant 0 : index
    %c0_19 = arith.constant 0 : index
    %10 = vector.load %arg5[%c1, %c0_18, %c0_19] : memref<9x8x32xbf16, #tpu.memory_space<vmem>>, vector<1x8x32xbf16>
    %11 = vector.shape_cast %10 : vector<1x8x32xbf16> to vector<8x32xbf16>
    %c2 = arith.constant 2 : index
    %c0_20 = arith.constant 0 : index
    %c0_21 = arith.constant 0 : index
    %12 = vector.load %arg5[%c2, %c0_20, %c0_21] : memref<9x8x32xbf16, #tpu.memory_space<vmem>>, vector<1x8x32xbf16>
    %13 = vector.shape_cast %12 : vector<1x8x32xbf16> to vector<8x32xbf16>
    %c3 = arith.constant 3 : index
    %c0_22 = arith.constant 0 : index
    %c0_23 = arith.constant 0 : index
    %14 = vector.load %arg5[%c3, %c0_22, %c0_23] : memref<9x8x32xbf16, #tpu.memory_space<vmem>>, vector<1x8x32xbf16>
    %15 = vector.shape_cast %14 : vector<1x8x32xbf16> to vector<8x32xbf16>
    %c4 = arith.constant 4 : index
    %c0_24 = arith.constant 0 : index
    %c0_25 = arith.constant 0 : index
    %16 = vector.load %arg5[%c4, %c0_24, %c0_25] : memref<9x8x32xbf16, #tpu.memory_space<vmem>>, vector<1x8x32xbf16>
    %17 = vector.shape_cast %16 : vector<1x8x32xbf16> to vector<8x32xbf16>
    %c5 = arith.constant 5 : index
    %c0_26 = arith.constant 0 : index
    %c0_27 = arith.constant 0 : index
    %18 = vector.load %arg5[%c5, %c0_26, %c0_27] : memref<9x8x32xbf16, #tpu.memory_space<vmem>>, vector<1x8x32xbf16>
    %19 = vector.shape_cast %18 : vector<1x8x32xbf16> to vector<8x32xbf16>
    %c6 = arith.constant 6 : index
    %c0_28 = arith.constant 0 : index
    %c0_29 = arith.constant 0 : index
    %20 = vector.load %arg5[%c6, %c0_28, %c0_29] : memref<9x8x32xbf16, #tpu.memory_space<vmem>>, vector<1x8x32xbf16>
    %21 = vector.shape_cast %20 : vector<1x8x32xbf16> to vector<8x32xbf16>
    %c7 = arith.constant 7 : index
    %c0_30 = arith.constant 0 : index
    %c0_31 = arith.constant 0 : index
    %22 = vector.load %arg5[%c7, %c0_30, %c0_31] : memref<9x8x32xbf16, #tpu.memory_space<vmem>>, vector<1x8x32xbf16>
    %23 = vector.shape_cast %22 : vector<1x8x32xbf16> to vector<8x32xbf16>
    %c8 = arith.constant 8 : index
    %c0_32 = arith.constant 0 : index
    %c0_33 = arith.constant 0 : index
    %24 = vector.load %arg5[%c8, %c0_32, %c0_33] : memref<9x8x32xbf16, #tpu.memory_space<vmem>>, vector<1x8x32xbf16>
    %25 = vector.shape_cast %24 : vector<1x8x32xbf16> to vector<8x32xbf16>
    %cst = arith.constant 0.000000e+00 : f32
    %26 = vector.broadcast %cst : f32 to vector<64x32xf32>
    %27 = vector.extract_strided_slice %1 {offsets = [0, 0, 0], sizes = [8, 8, 8], strides = [1, 1, 1]} : vector<9x9x8xbf16> to vector<8x8x8xbf16>
    %28 = vector.shape_cast %27 : vector<8x8x8xbf16> to vector<64x8xbf16>
    %cst_34 = arith.constant dense<0.000000e+00> : vector<64x32xf32>
    %29 = tpu.matmul %28, %9, %cst_34 {dimension_numbers = #tpu.dot_dimension_numbers<[1], [0], [0], [1], [0, 0, 1, 1], [], []>} : vector<64x8xbf16>, vector<8x32xbf16>, vector<64x32xf32> -> vector<64x32xf32>
    %30 = arith.addf %26, %29 : vector<64x32xf32>
    %31 = vector.extract_strided_slice %3 {offsets = [0, 0, 0], sizes = [8, 8, 8], strides = [1, 1, 1]} : vector<9x9x8xbf16> to vector<8x8x8xbf16>
    %32 = vector.shape_cast %31 : vector<8x8x8xbf16> to vector<64x8xbf16>
    %cst_35 = arith.constant dense<0.000000e+00> : vector<64x32xf32>
    %33 = tpu.matmul %32, %11, %cst_35 {dimension_numbers = #tpu.dot_dimension_numbers<[1], [0], [0], [1], [0, 0, 1, 1], [], []>} : vector<64x8xbf16>, vector<8x32xbf16>, vector<64x32xf32> -> vector<64x32xf32>
    %34 = arith.addf %30, %33 : vector<64x32xf32>
    %35 = vector.extract_strided_slice %1 {offsets = [0, 1, 0], sizes = [8, 8, 8], strides = [1, 1, 1]} : vector<9x9x8xbf16> to vector<8x8x8xbf16>
    %36 = vector.shape_cast %35 : vector<8x8x8xbf16> to vector<64x8xbf16>
    %cst_36 = arith.constant dense<0.000000e+00> : vector<64x32xf32>
    %37 = tpu.matmul %36, %13, %cst_36 {dimension_numbers = #tpu.dot_dimension_numbers<[1], [0], [0], [1], [0, 0, 1, 1], [], []>} : vector<64x8xbf16>, vector<8x32xbf16>, vector<64x32xf32> -> vector<64x32xf32>
    %38 = arith.addf %34, %37 : vector<64x32xf32>
    %39 = vector.extract_strided_slice %5 {offsets = [0, 0, 0], sizes = [8, 8, 8], strides = [1, 1, 1]} : vector<9x9x8xbf16> to vector<8x8x8xbf16>
    %40 = vector.shape_cast %39 : vector<8x8x8xbf16> to vector<64x8xbf16>
    %cst_37 = arith.constant dense<0.000000e+00> : vector<64x32xf32>
    %41 = tpu.matmul %40, %15, %cst_37 {dimension_numbers = #tpu.dot_dimension_numbers<[1], [0], [0], [1], [0, 0, 1, 1], [], []>} : vector<64x8xbf16>, vector<8x32xbf16>, vector<64x32xf32> -> vector<64x32xf32>
    %42 = arith.addf %38, %41 : vector<64x32xf32>
    %43 = vector.extract_strided_slice %7 {offsets = [0, 0, 0], sizes = [8, 8, 8], strides = [1, 1, 1]} : vector<9x9x8xbf16> to vector<8x8x8xbf16>
    %44 = vector.shape_cast %43 : vector<8x8x8xbf16> to vector<64x8xbf16>
    %cst_38 = arith.constant dense<0.000000e+00> : vector<64x32xf32>
    %45 = tpu.matmul %44, %17, %cst_38 {dimension_numbers = #tpu.dot_dimension_numbers<[1], [0], [0], [1], [0, 0, 1, 1], [], []>} : vector<64x8xbf16>, vector<8x32xbf16>, vector<64x32xf32> -> vector<64x32xf32>
    %46 = arith.addf %42, %45 : vector<64x32xf32>
    %47 = vector.extract_strided_slice %5 {offsets = [0, 1, 0], sizes = [8, 8, 8], strides = [1, 1, 1]} : vector<9x9x8xbf16> to vector<8x8x8xbf16>
    %48 = vector.shape_cast %47 : vector<8x8x8xbf16> to vector<64x8xbf16>
    %cst_39 = arith.constant dense<0.000000e+00> : vector<64x32xf32>
    %49 = tpu.matmul %48, %19, %cst_39 {dimension_numbers = #tpu.dot_dimension_numbers<[1], [0], [0], [1], [0, 0, 1, 1], [], []>} : vector<64x8xbf16>, vector<8x32xbf16>, vector<64x32xf32> -> vector<64x32xf32>
    %50 = arith.addf %46, %49 : vector<64x32xf32>
    %51 = vector.extract_strided_slice %1 {offsets = [1, 0, 0], sizes = [8, 8, 8], strides = [1, 1, 1]} : vector<9x9x8xbf16> to vector<8x8x8xbf16>
    %52 = vector.shape_cast %51 : vector<8x8x8xbf16> to vector<64x8xbf16>
    %cst_40 = arith.constant dense<0.000000e+00> : vector<64x32xf32>
    %53 = tpu.matmul %52, %21, %cst_40 {dimension_numbers = #tpu.dot_dimension_numbers<[1], [0], [0], [1], [0, 0, 1, 1], [], []>} : vector<64x8xbf16>, vector<8x32xbf16>, vector<64x32xf32> -> vector<64x32xf32>
    %54 = arith.addf %50, %53 : vector<64x32xf32>
    %55 = vector.extract_strided_slice %3 {offsets = [1, 0, 0], sizes = [8, 8, 8], strides = [1, 1, 1]} : vector<9x9x8xbf16> to vector<8x8x8xbf16>
    %56 = vector.shape_cast %55 : vector<8x8x8xbf16> to vector<64x8xbf16>
    %cst_41 = arith.constant dense<0.000000e+00> : vector<64x32xf32>
    %57 = tpu.matmul %56, %23, %cst_41 {dimension_numbers = #tpu.dot_dimension_numbers<[1], [0], [0], [1], [0, 0, 1, 1], [], []>} : vector<64x8xbf16>, vector<8x32xbf16>, vector<64x32xf32> -> vector<64x32xf32>
    %58 = arith.addf %54, %57 : vector<64x32xf32>
    %59 = vector.extract_strided_slice %1 {offsets = [1, 1, 0], sizes = [8, 8, 8], strides = [1, 1, 1]} : vector<9x9x8xbf16> to vector<8x8x8xbf16>
    %60 = vector.shape_cast %59 : vector<8x8x8xbf16> to vector<64x8xbf16>
    %cst_42 = arith.constant dense<0.000000e+00> : vector<64x32xf32>
    %61 = tpu.matmul %60, %25, %cst_42 {dimension_numbers = #tpu.dot_dimension_numbers<[1], [0], [0], [1], [0, 0, 1, 1], [], []>} : vector<64x8xbf16>, vector<8x32xbf16>, vector<64x32xf32> -> vector<64x32xf32>
    %62 = arith.addf %58, %61 : vector<64x32xf32>
    %cst_43 = arith.constant 0.000000e+00 : f32
    %63 = vector.broadcast %cst_43 : f32 to vector<64x32xf32>
    %64 = vector.extract_strided_slice %3 {offsets = [0, 0, 0], sizes = [8, 8, 8], strides = [1, 1, 1]} : vector<9x9x8xbf16> to vector<8x8x8xbf16>
    %65 = vector.shape_cast %64 : vector<8x8x8xbf16> to vector<64x8xbf16>
    %cst_44 = arith.constant dense<0.000000e+00> : vector<64x32xf32>
    %66 = tpu.matmul %65, %9, %cst_44 {dimension_numbers = #tpu.dot_dimension_numbers<[1], [0], [0], [1], [0, 0, 1, 1], [], []>} : vector<64x8xbf16>, vector<8x32xbf16>, vector<64x32xf32> -> vector<64x32xf32>
    %67 = arith.addf %63, %66 : vector<64x32xf32>
    %68 = vector.extract_strided_slice %1 {offsets = [0, 1, 0], sizes = [8, 8, 8], strides = [1, 1, 1]} : vector<9x9x8xbf16> to vector<8x8x8xbf16>
    %69 = vector.shape_cast %68 : vector<8x8x8xbf16> to vector<64x8xbf16>
    %cst_45 = arith.constant dense<0.000000e+00> : vector<64x32xf32>
    %70 = tpu.matmul %69, %11, %cst_45 {dimension_numbers = #tpu.dot_dimension_numbers<[1], [0], [0], [1], [0, 0, 1, 1], [], []>} : vector<64x8xbf16>, vector<8x32xbf16>, vector<64x32xf32> -> vector<64x32xf32>
    %71 = arith.addf %67, %70 : vector<64x32xf32>
    %72 = vector.extract_strided_slice %3 {offsets = [0, 1, 0], sizes = [8, 8, 8], strides = [1, 1, 1]} : vector<9x9x8xbf16> to vector<8x8x8xbf16>
    %73 = vector.shape_cast %72 : vector<8x8x8xbf16> to vector<64x8xbf16>
    %cst_46 = arith.constant dense<0.000000e+00> : vector<64x32xf32>
    %74 = tpu.matmul %73, %13, %cst_46 {dimension_numbers = #tpu.dot_dimension_numbers<[1], [0], [0], [1], [0, 0, 1, 1], [], []>} : vector<64x8xbf16>, vector<8x32xbf16>, vector<64x32xf32> -> vector<64x32xf32>
    %75 = arith.addf %71, %74 : vector<64x32xf32>
    %76 = vector.extract_strided_slice %7 {offsets = [0, 0, 0], sizes = [8, 8, 8], strides = [1, 1, 1]} : vector<9x9x8xbf16> to vector<8x8x8xbf16>
    %77 = vector.shape_cast %76 : vector<8x8x8xbf16> to vector<64x8xbf16>
    %cst_47 = arith.constant dense<0.000000e+00> : vector<64x32xf32>
    %78 = tpu.matmul %77, %15, %cst_47 {dimension_numbers = #tpu.dot_dimension_numbers<[1], [0], [0], [1], [0, 0, 1, 1], [], []>} : vector<64x8xbf16>, vector<8x32xbf16>, vector<64x32xf32> -> vector<64x32xf32>
    %79 = arith.addf %75, %78 : vector<64x32xf32>
    %80 = vector.extract_strided_slice %5 {offsets = [0, 1, 0], sizes = [8, 8, 8], strides = [1, 1, 1]} : vector<9x9x8xbf16> to vector<8x8x8xbf16>
    %81 = vector.shape_cast %80 : vector<8x8x8xbf16> to vector<64x8xbf16>
    %cst_48 = arith.constant dense<0.000000e+00> : vector<64x32xf32>
    %82 = tpu.matmul %81, %17, %cst_48 {dimension_numbers = #tpu.dot_dimension_numbers<[1], [0], [0], [1], [0, 0, 1, 1], [], []>} : vector<64x8xbf16>, vector<8x32xbf16>, vector<64x32xf32> -> vector<64x32xf32>
    %83 = arith.addf %79, %82 : vector<64x32xf32>
    %84 = vector.extract_strided_slice %7 {offsets = [0, 1, 0], sizes = [8, 8, 8], strides = [1, 1, 1]} : vector<9x9x8xbf16> to vector<8x8x8xbf16>
    %85 = vector.shape_cast %84 : vector<8x8x8xbf16> to vector<64x8xbf16>
    %cst_49 = arith.constant dense<0.000000e+00> : vector<64x32xf32>
    %86 = tpu.matmul %85, %19, %cst_49 {dimension_numbers = #tpu.dot_dimension_numbers<[1], [0], [0], [1], [0, 0, 1, 1], [], []>} : vector<64x8xbf16>, vector<8x32xbf16>, vector<64x32xf32> -> vector<64x32xf32>
    %87 = arith.addf %83, %86 : vector<64x32xf32>
    %88 = vector.extract_strided_slice %3 {offsets = [1, 0, 0], sizes = [8, 8, 8], strides = [1, 1, 1]} : vector<9x9x8xbf16> to vector<8x8x8xbf16>
    %89 = vector.shape_cast %88 : vector<8x8x8xbf16> to vector<64x8xbf16>
    %cst_50 = arith.constant dense<0.000000e+00> : vector<64x32xf32>
    %90 = tpu.matmul %89, %21, %cst_50 {dimension_numbers = #tpu.dot_dimension_numbers<[1], [0], [0], [1], [0, 0, 1, 1], [], []>} : vector<64x8xbf16>, vector<8x32xbf16>, vector<64x32xf32> -> vector<64x32xf32>
    %91 = arith.addf %87, %90 : vector<64x32xf32>
    %92 = vector.extract_strided_slice %1 {offsets = [1, 1, 0], sizes = [8, 8, 8], strides = [1, 1, 1]} : vector<9x9x8xbf16> to vector<8x8x8xbf16>
    %93 = vector.shape_cast %92 : vector<8x8x8xbf16> to vector<64x8xbf16>
    %cst_51 = arith.constant dense<0.000000e+00> : vector<64x32xf32>
    %94 = tpu.matmul %93, %23, %cst_51 {dimension_numbers = #tpu.dot_dimension_numbers<[1], [0], [0], [1], [0, 0, 1, 1], [], []>} : vector<64x8xbf16>, vector<8x32xbf16>, vector<64x32xf32> -> vector<64x32xf32>
    %95 = arith.addf %91, %94 : vector<64x32xf32>
    %96 = vector.extract_strided_slice %3 {offsets = [1, 1, 0], sizes = [8, 8, 8], strides = [1, 1, 1]} : vector<9x9x8xbf16> to vector<8x8x8xbf16>
    %97 = vector.shape_cast %96 : vector<8x8x8xbf16> to vector<64x8xbf16>
    %cst_52 = arith.constant dense<0.000000e+00> : vector<64x32xf32>
    %98 = tpu.matmul %97, %25, %cst_52 {dimension_numbers = #tpu.dot_dimension_numbers<[1], [0], [0], [1], [0, 0, 1, 1], [], []>} : vector<64x8xbf16>, vector<8x32xbf16>, vector<64x32xf32> -> vector<64x32xf32>
    %99 = arith.addf %95, %98 : vector<64x32xf32>
    %100 = arith.maximumf %62, %99 : vector<64x32xf32>
    %cst_53 = arith.constant 0.000000e+00 : f32
    %101 = vector.broadcast %cst_53 : f32 to vector<64x32xf32>
    %102 = vector.extract_strided_slice %5 {offsets = [0, 0, 0], sizes = [8, 8, 8], strides = [1, 1, 1]} : vector<9x9x8xbf16> to vector<8x8x8xbf16>
    %103 = vector.shape_cast %102 : vector<8x8x8xbf16> to vector<64x8xbf16>
    %cst_54 = arith.constant dense<0.000000e+00> : vector<64x32xf32>
    %104 = tpu.matmul %103, %9, %cst_54 {dimension_numbers = #tpu.dot_dimension_numbers<[1], [0], [0], [1], [0, 0, 1, 1], [], []>} : vector<64x8xbf16>, vector<8x32xbf16>, vector<64x32xf32> -> vector<64x32xf32>
    %105 = arith.addf %101, %104 : vector<64x32xf32>
    %106 = vector.extract_strided_slice %7 {offsets = [0, 0, 0], sizes = [8, 8, 8], strides = [1, 1, 1]} : vector<9x9x8xbf16> to vector<8x8x8xbf16>
    %107 = vector.shape_cast %106 : vector<8x8x8xbf16> to vector<64x8xbf16>
    %cst_55 = arith.constant dense<0.000000e+00> : vector<64x32xf32>
    %108 = tpu.matmul %107, %11, %cst_55 {dimension_numbers = #tpu.dot_dimension_numbers<[1], [0], [0], [1], [0, 0, 1, 1], [], []>} : vector<64x8xbf16>, vector<8x32xbf16>, vector<64x32xf32> -> vector<64x32xf32>
    %109 = arith.addf %105, %108 : vector<64x32xf32>
    %110 = vector.extract_strided_slice %5 {offsets = [0, 1, 0], sizes = [8, 8, 8], strides = [1, 1, 1]} : vector<9x9x8xbf16> to vector<8x8x8xbf16>
    %111 = vector.shape_cast %110 : vector<8x8x8xbf16> to vector<64x8xbf16>
    %cst_56 = arith.constant dense<0.000000e+00> : vector<64x32xf32>
    %112 = tpu.matmul %111, %13, %cst_56 {dimension_numbers = #tpu.dot_dimension_numbers<[1], [0], [0], [1], [0, 0, 1, 1], [], []>} : vector<64x8xbf16>, vector<8x32xbf16>, vector<64x32xf32> -> vector<64x32xf32>
    %113 = arith.addf %109, %112 : vector<64x32xf32>
    %114 = vector.extract_strided_slice %1 {offsets = [1, 0, 0], sizes = [8, 8, 8], strides = [1, 1, 1]} : vector<9x9x8xbf16> to vector<8x8x8xbf16>
    %115 = vector.shape_cast %114 : vector<8x8x8xbf16> to vector<64x8xbf16>
    %cst_57 = arith.constant dense<0.000000e+00> : vector<64x32xf32>
    %116 = tpu.matmul %115, %15, %cst_57 {dimension_numbers = #tpu.dot_dimension_numbers<[1], [0], [0], [1], [0, 0, 1, 1], [], []>} : vector<64x8xbf16>, vector<8x32xbf16>, vector<64x32xf32> -> vector<64x32xf32>
    %117 = arith.addf %113, %116 : vector<64x32xf32>
    %118 = vector.extract_strided_slice %3 {offsets = [1, 0, 0], sizes = [8, 8, 8], strides = [1, 1, 1]} : vector<9x9x8xbf16> to vector<8x8x8xbf16>
    %119 = vector.shape_cast %118 : vector<8x8x8xbf16> to vector<64x8xbf16>
    %cst_58 = arith.constant dense<0.000000e+00> : vector<64x32xf32>
    %120 = tpu.matmul %119, %17, %cst_58 {dimension_numbers = #tpu.dot_dimension_numbers<[1], [0], [0], [1], [0, 0, 1, 1], [], []>} : vector<64x8xbf16>, vector<8x32xbf16>, vector<64x32xf32> -> vector<64x32xf32>
    %121 = arith.addf %117, %120 : vector<64x32xf32>
    %122 = vector.extract_strided_slice %1 {offsets = [1, 1, 0], sizes = [8, 8, 8], strides = [1, 1, 1]} : vector<9x9x8xbf16> to vector<8x8x8xbf16>
    %123 = vector.shape_cast %122 : vector<8x8x8xbf16> to vector<64x8xbf16>
    %cst_59 = arith.constant dense<0.000000e+00> : vector<64x32xf32>
    %124 = tpu.matmul %123, %19, %cst_59 {dimension_numbers = #tpu.dot_dimension_numbers<[1], [0], [0], [1], [0, 0, 1, 1], [], []>} : vector<64x8xbf16>, vector<8x32xbf16>, vector<64x32xf32> -> vector<64x32xf32>
    %125 = arith.addf %121, %124 : vector<64x32xf32>
    %126 = vector.extract_strided_slice %5 {offsets = [1, 0, 0], sizes = [8, 8, 8], strides = [1, 1, 1]} : vector<9x9x8xbf16> to vector<8x8x8xbf16>
    %127 = vector.shape_cast %126 : vector<8x8x8xbf16> to vector<64x8xbf16>
    %cst_60 = arith.constant dense<0.000000e+00> : vector<64x32xf32>
    %128 = tpu.matmul %127, %21, %cst_60 {dimension_numbers = #tpu.dot_dimension_numbers<[1], [0], [0], [1], [0, 0, 1, 1], [], []>} : vector<64x8xbf16>, vector<8x32xbf16>, vector<64x32xf32> -> vector<64x32xf32>
    %129 = arith.addf %125, %128 : vector<64x32xf32>
    %130 = vector.extract_strided_slice %7 {offsets = [1, 0, 0], sizes = [8, 8, 8], strides = [1, 1, 1]} : vector<9x9x8xbf16> to vector<8x8x8xbf16>
    %131 = vector.shape_cast %130 : vector<8x8x8xbf16> to vector<64x8xbf16>
    %cst_61 = arith.constant dense<0.000000e+00> : vector<64x32xf32>
    %132 = tpu.matmul %131, %23, %cst_61 {dimension_numbers = #tpu.dot_dimension_numbers<[1], [0], [0], [1], [0, 0, 1, 1], [], []>} : vector<64x8xbf16>, vector<8x32xbf16>, vector<64x32xf32> -> vector<64x32xf32>
    %133 = arith.addf %129, %132 : vector<64x32xf32>
    %134 = vector.extract_strided_slice %5 {offsets = [1, 1, 0], sizes = [8, 8, 8], strides = [1, 1, 1]} : vector<9x9x8xbf16> to vector<8x8x8xbf16>
    %135 = vector.shape_cast %134 : vector<8x8x8xbf16> to vector<64x8xbf16>
    %cst_62 = arith.constant dense<0.000000e+00> : vector<64x32xf32>
    %136 = tpu.matmul %135, %25, %cst_62 {dimension_numbers = #tpu.dot_dimension_numbers<[1], [0], [0], [1], [0, 0, 1, 1], [], []>} : vector<64x8xbf16>, vector<8x32xbf16>, vector<64x32xf32> -> vector<64x32xf32>
    %137 = arith.addf %133, %136 : vector<64x32xf32>
    %138 = arith.maximumf %100, %137 : vector<64x32xf32>
    %cst_63 = arith.constant 0.000000e+00 : f32
    %139 = vector.broadcast %cst_63 : f32 to vector<64x32xf32>
    %140 = vector.extract_strided_slice %7 {offsets = [0, 0, 0], sizes = [8, 8, 8], strides = [1, 1, 1]} : vector<9x9x8xbf16> to vector<8x8x8xbf16>
    %141 = vector.shape_cast %140 : vector<8x8x8xbf16> to vector<64x8xbf16>
    %cst_64 = arith.constant dense<0.000000e+00> : vector<64x32xf32>
    %142 = tpu.matmul %141, %9, %cst_64 {dimension_numbers = #tpu.dot_dimension_numbers<[1], [0], [0], [1], [0, 0, 1, 1], [], []>} : vector<64x8xbf16>, vector<8x32xbf16>, vector<64x32xf32> -> vector<64x32xf32>
    %143 = arith.addf %139, %142 : vector<64x32xf32>
    %144 = vector.extract_strided_slice %5 {offsets = [0, 1, 0], sizes = [8, 8, 8], strides = [1, 1, 1]} : vector<9x9x8xbf16> to vector<8x8x8xbf16>
    %145 = vector.shape_cast %144 : vector<8x8x8xbf16> to vector<64x8xbf16>
    %cst_65 = arith.constant dense<0.000000e+00> : vector<64x32xf32>
    %146 = tpu.matmul %145, %11, %cst_65 {dimension_numbers = #tpu.dot_dimension_numbers<[1], [0], [0], [1], [0, 0, 1, 1], [], []>} : vector<64x8xbf16>, vector<8x32xbf16>, vector<64x32xf32> -> vector<64x32xf32>
    %147 = arith.addf %143, %146 : vector<64x32xf32>
    %148 = vector.extract_strided_slice %7 {offsets = [0, 1, 0], sizes = [8, 8, 8], strides = [1, 1, 1]} : vector<9x9x8xbf16> to vector<8x8x8xbf16>
    %149 = vector.shape_cast %148 : vector<8x8x8xbf16> to vector<64x8xbf16>
    %cst_66 = arith.constant dense<0.000000e+00> : vector<64x32xf32>
    %150 = tpu.matmul %149, %13, %cst_66 {dimension_numbers = #tpu.dot_dimension_numbers<[1], [0], [0], [1], [0, 0, 1, 1], [], []>} : vector<64x8xbf16>, vector<8x32xbf16>, vector<64x32xf32> -> vector<64x32xf32>
    %151 = arith.addf %147, %150 : vector<64x32xf32>
    %152 = vector.extract_strided_slice %3 {offsets = [1, 0, 0], sizes = [8, 8, 8], strides = [1, 1, 1]} : vector<9x9x8xbf16> to vector<8x8x8xbf16>
    %153 = vector.shape_cast %152 : vector<8x8x8xbf16> to vector<64x8xbf16>
    %cst_67 = arith.constant dense<0.000000e+00> : vector<64x32xf32>
    %154 = tpu.matmul %153, %15, %cst_67 {dimension_numbers = #tpu.dot_dimension_numbers<[1], [0], [0], [1], [0, 0, 1, 1], [], []>} : vector<64x8xbf16>, vector<8x32xbf16>, vector<64x32xf32> -> vector<64x32xf32>
    %155 = arith.addf %151, %154 : vector<64x32xf32>
    %156 = vector.extract_strided_slice %1 {offsets = [1, 1, 0], sizes = [8, 8, 8], strides = [1, 1, 1]} : vector<9x9x8xbf16> to vector<8x8x8xbf16>
    %157 = vector.shape_cast %156 : vector<8x8x8xbf16> to vector<64x8xbf16>
    %cst_68 = arith.constant dense<0.000000e+00> : vector<64x32xf32>
    %158 = tpu.matmul %157, %17, %cst_68 {dimension_numbers = #tpu.dot_dimension_numbers<[1], [0], [0], [1], [0, 0, 1, 1], [], []>} : vector<64x8xbf16>, vector<8x32xbf16>, vector<64x32xf32> -> vector<64x32xf32>
    %159 = arith.addf %155, %158 : vector<64x32xf32>
    %160 = vector.extract_strided_slice %3 {offsets = [1, 1, 0], sizes = [8, 8, 8], strides = [1, 1, 1]} : vector<9x9x8xbf16> to vector<8x8x8xbf16>
    %161 = vector.shape_cast %160 : vector<8x8x8xbf16> to vector<64x8xbf16>
    %cst_69 = arith.constant dense<0.000000e+00> : vector<64x32xf32>
    %162 = tpu.matmul %161, %19, %cst_69 {dimension_numbers = #tpu.dot_dimension_numbers<[1], [0], [0], [1], [0, 0, 1, 1], [], []>} : vector<64x8xbf16>, vector<8x32xbf16>, vector<64x32xf32> -> vector<64x32xf32>
    %163 = arith.addf %159, %162 : vector<64x32xf32>
    %164 = vector.extract_strided_slice %7 {offsets = [1, 0, 0], sizes = [8, 8, 8], strides = [1, 1, 1]} : vector<9x9x8xbf16> to vector<8x8x8xbf16>
    %165 = vector.shape_cast %164 : vector<8x8x8xbf16> to vector<64x8xbf16>
    %cst_70 = arith.constant dense<0.000000e+00> : vector<64x32xf32>
    %166 = tpu.matmul %165, %21, %cst_70 {dimension_numbers = #tpu.dot_dimension_numbers<[1], [0], [0], [1], [0, 0, 1, 1], [], []>} : vector<64x8xbf16>, vector<8x32xbf16>, vector<64x32xf32> -> vector<64x32xf32>
    %167 = arith.addf %163, %166 : vector<64x32xf32>
    %168 = vector.extract_strided_slice %5 {offsets = [1, 1, 0], sizes = [8, 8, 8], strides = [1, 1, 1]} : vector<9x9x8xbf16> to vector<8x8x8xbf16>
    %169 = vector.shape_cast %168 : vector<8x8x8xbf16> to vector<64x8xbf16>
    %cst_71 = arith.constant dense<0.000000e+00> : vector<64x32xf32>
    %170 = tpu.matmul %169, %23, %cst_71 {dimension_numbers = #tpu.dot_dimension_numbers<[1], [0], [0], [1], [0, 0, 1, 1], [], []>} : vector<64x8xbf16>, vector<8x32xbf16>, vector<64x32xf32> -> vector<64x32xf32>
    %171 = arith.addf %167, %170 : vector<64x32xf32>
    %172 = vector.extract_strided_slice %7 {offsets = [1, 1, 0], sizes = [8, 8, 8], strides = [1, 1, 1]} : vector<9x9x8xbf16> to vector<8x8x8xbf16>
    %173 = vector.shape_cast %172 : vector<8x8x8xbf16> to vector<64x8xbf16>
    %cst_72 = arith.constant dense<0.000000e+00> : vector<64x32xf32>
    %174 = tpu.matmul %173, %25, %cst_72 {dimension_numbers = #tpu.dot_dimension_numbers<[1], [0], [0], [1], [0, 0, 1, 1], [], []>} : vector<64x8xbf16>, vector<8x32xbf16>, vector<64x32xf32> -> vector<64x32xf32>
    %175 = arith.addf %171, %174 : vector<64x32xf32>
    %176 = arith.maximumf %138, %175 : vector<64x32xf32>
    %c0_73 = arith.constant 0 : index
    %c0_74 = arith.constant 0 : index
    %177 = vector.load %arg6[%c0_73, %c0_74] : memref<1x32xf32, #tpu.memory_space<vmem>>, vector<1x32xf32>
    %178 = vector.broadcast %177 : vector<1x32xf32> to vector<64x32xf32>
    %179 = arith.addf %176, %178 : vector<64x32xf32>
    %cst_75 = arith.constant 0.000000e+00 : f32
    %180 = vector.broadcast %cst_75 : f32 to vector<64x32xf32>
    %181 = arith.maximumf %179, %180 : vector<64x32xf32>
    %182 = arith.truncf %181 : vector<64x32xf32> to vector<64x32xbf16>
    %c0_76 = arith.constant 0 : index
    %c0_77 = arith.constant 0 : index
    %c0_78 = arith.constant 0 : index
    %183 = vector.load %arg7[%c0_76, %c0_77, %c0_78] : memref<1x64x32xbf16, #tpu.memory_space<vmem>>, vector<1x64x32xbf16>
    %184 = vector.shape_cast %183 : vector<1x64x32xbf16> to vector<64x32xbf16>
    %185 = vector.shape_cast %182 : vector<64x32xbf16> to vector<1x64x32xbf16>
    tpu.vector_store %arg7[%c0_76, %c0_77, %c0_78], %185 {strides = array<i32>} : memref<1x64x32xbf16, #tpu.memory_space<vmem>>, vector<1x64x32xbf16>,
    return
  }
  func.func @transform_0(%arg0: i32) -> (i32, i32, i32, i32) {
    %c0_i32 = arith.constant 0 : i32
    %c0_i32_0 = arith.constant 0 : i32
    %c0_i32_1 = arith.constant 0 : i32
    %c0_i32_2 = arith.constant 0 : i32
    return %arg0, %c0_i32, %c0_i32_0, %c0_i32_1 : i32, i32, i32, i32
  }
  func.func @transform_1(%arg0: i32) -> (i32, i32, i32, i32) {
    %c0_i32 = arith.constant 0 : i32
    %c0_i32_0 = arith.constant 0 : i32
    %c0_i32_1 = arith.constant 0 : i32
    %c0_i32_2 = arith.constant 0 : i32
    return %arg0, %c0_i32, %c0_i32_0, %c0_i32_1 : i32, i32, i32, i32
  }
  func.func @transform_2(%arg0: i32) -> (i32, i32, i32, i32) {
    %c0_i32 = arith.constant 0 : i32
    %c0_i32_0 = arith.constant 0 : i32
    %c0_i32_1 = arith.constant 0 : i32
    %c0_i32_2 = arith.constant 0 : i32
    return %arg0, %c0_i32, %c0_i32_0, %c0_i32_1 : i32, i32, i32, i32
  }
  func.func @transform_3(%arg0: i32) -> (i32, i32, i32, i32) {
    %c0_i32 = arith.constant 0 : i32
    %c0_i32_0 = arith.constant 0 : i32
    %c0_i32_1 = arith.constant 0 : i32
    %c0_i32_2 = arith.constant 0 : i32
    return %arg0, %c0_i32, %c0_i32_0, %c0_i32_1 : i32, i32, i32, i32
  }
  func.func @transform_4(%arg0: i32) -> (i32, i32, i32) {
    %c0_i32 = arith.constant 0 : i32
    %c0_i32_0 = arith.constant 0 : i32
    %c0_i32_1 = arith.constant 0 : i32
    %c0_i32_2 = arith.constant 0 : i32
    return %c0_i32, %c0_i32_0, %c0_i32_1 : i32, i32, i32
  }
  func.func @transform_5(%arg0: i32) -> (i32, i32) {
    %c0_i32 = arith.constant 0 : i32
    %c0_i32_0 = arith.constant 0 : i32
    %c0_i32_1 = arith.constant 0 : i32
    return %c0_i32, %c0_i32_0 : i32, i32
  }
  func.func @transform_6(%arg0: i32) -> (i32, i32, i32) {
    %c0_i32 = arith.constant 0 : i32
    %c0_i32_0 = arith.constant 0 : i32
    %c0_i32_1 = arith.constant 0 : i32
    return %arg0, %c0_i32, %c0_i32_0 : i32, i32, i32
  }
}

module attributes {stable_mosaic.version = 11 : i64} {
  func.func @_matmul_bias_act_kernel(%arg0: i32, %arg1: memref<128x32xbf16, #tpu.memory_space<vmem>>, %arg2: memref<32x128xbf16, #tpu.memory_space<vmem>>, %arg3: memref<1x128xf32, #tpu.memory_space<vmem>>, %arg4: memref<128x128xf32, #tpu.memory_space<vmem>>) attributes {dimension_semantics = [#tpu.dimension_semantics<parallel>], iteration_bounds = array<i64: 1>, scalar_prefetch = 0 : i64, scratch_operands = 0 : i64, tpu.core_type = #tpu.core_type<tc>, window_params = [{transform_indices = @transform_0, window_bounds = array<i64: 128, 32>}, {pipeline_mode = #tpu.pipeline_mode<synchronous>, transform_indices = @transform_1, window_bounds = array<i64: 32, 128>}, {pipeline_mode = #tpu.pipeline_mode<synchronous>, transform_indices = @transform_2, window_bounds = array<i64: 1, 128>}, {transform_indices = @transform_3, window_bounds = array<i64: 128, 128>}]} {
    %c0 = arith.constant 0 : index
    %c0_0 = arith.constant 0 : index
    %0 = vector.load %arg1[%c0, %c0_0] : memref<128x32xbf16, #tpu.memory_space<vmem>>, vector<128x32xbf16>
    %c0_1 = arith.constant 0 : index
    %c0_2 = arith.constant 0 : index
    %1 = vector.load %arg2[%c0_1, %c0_2] : memref<32x128xbf16, #tpu.memory_space<vmem>>, vector<32x128xbf16>
    %cst = arith.constant dense<0.000000e+00> : vector<128x128xf32>
    %2 = tpu.matmul %0, %1, %cst {dimension_numbers = #tpu.dot_dimension_numbers<[1], [0], [0], [1], [0, 0, 1, 1], [], []>} : vector<128x32xbf16>, vector<32x128xbf16>, vector<128x128xf32> -> vector<128x128xf32>
    %c0_3 = arith.constant 0 : index
    %c0_4 = arith.constant 0 : index
    %3 = vector.load %arg3[%c0_3, %c0_4] : memref<1x128xf32, #tpu.memory_space<vmem>>, vector<1x128xf32>
    %4 = vector.broadcast %3 : vector<1x128xf32> to vector<128x128xf32>
    %5 = arith.addf %2, %4 : vector<128x128xf32>
    %c0_5 = arith.constant 0 : index
    %c0_6 = arith.constant 0 : index
    %6 = vector.load %arg4[%c0_5, %c0_6] : memref<128x128xf32, #tpu.memory_space<vmem>>, vector<128x128xf32>
    tpu.vector_store %arg4[%c0_5, %c0_6], %5 {strides = array<i32>} : memref<128x128xf32, #tpu.memory_space<vmem>>, vector<128x128xf32>,
    return
  }
  func.func @transform_0(%arg0: i32) -> (i32, i32) {
    %c0_i32 = arith.constant 0 : i32
    %c0_i32_0 = arith.constant 0 : i32
    return %arg0, %c0_i32 : i32, i32
  }
  func.func @transform_1(%arg0: i32) -> (i32, i32) {
    %c0_i32 = arith.constant 0 : i32
    %c0_i32_0 = arith.constant 0 : i32
    %c0_i32_1 = arith.constant 0 : i32
    return %c0_i32, %c0_i32_0 : i32, i32
  }
  func.func @transform_2(%arg0: i32) -> (i32, i32) {
    %c0_i32 = arith.constant 0 : i32
    %c0_i32_0 = arith.constant 0 : i32
    %c0_i32_1 = arith.constant 0 : i32
    return %c0_i32, %c0_i32_0 : i32, i32
  }
  func.func @transform_3(%arg0: i32) -> (i32, i32) {
    %c0_i32 = arith.constant 0 : i32
    %c0_i32_0 = arith.constant 0 : i32
    return %arg0, %c0_i32 : i32, i32
  }
}

</mosaic_0001>

<bundles_post_ra>
// kernel: forward.3
= control target key start
LH: loop header
LB: loop body
LE: loop exit
PB: predicated region body
PF: predicated region fallthrough
CT: control target
= control target key end

     0   :  { %vm94_vm0 = vcmask 261120   ;;  %s408_s1 = inlined_call_operand.vmem [shape: bf16[32,128], index: 1, kind: input, shape index: {}]   ;;  %s409_s0 = inlined_call_operand.vmem [shape: bf16[128,32], index: 0, kind: input, shape index: {}]   ;;  %s410_s2 = inlined_call_operand.vmem [shape: f32[1,128], index: 2, kind: input, shape index: {}]   ;;  %s411_s3 = inlined_call_operand.vmem [shape: f32[128,128], index: 3, kind: output, shape index: {}]  }
   0x1   :  { %v289_v0 = vld [vmem:[%s408_s1 + $0x8] sm:$0xff]   ;;  %v290_v1 = vld [vmem:[%s408_s1] sm:$0xff]   ;;  %v295_v6 = vld [vmem:[%s409_s0 + $0x10] sm:$0xff]  }
   0x2   :  { %265 = vmatprep.subr.bf16.mxu0 %v289_v0  ;;  %285 = vmatprep.subr.bf16.mxu1 %v289_v0  ;;  %v291_v2 = vld [vmem:[%s409_s0] sm:$0xff]   ;;  %v293_v4 = vld [vmem:[%s409_s0 + $0x8] sm:$0xff]   ;;  %v296_v7 = vld [vmem:[%s409_s0 + $0x30] sm:$0xff]  }
   0x3   :  { %266 = vmatpush3.bf16.msra.mxu0 %v289_v0  ;;  %287 = vmatpush3.bf16.msra.mxu1 %v289_v0  ;;  %v292_v3 = vld [vmem:[%s409_s0 + $0x20] sm:$0xff]   ;;  %v294_v5 = vld [vmem:[%s409_s0 + $0x28] sm:$0xff]   ;;  %v297_v8 = vld [vmem:[%s409_s0 + $0x18] sm:$0xff]  }
   0x4   :  { %267 = vmatprep.subr.bf16.mxu0 %v290_v1  ;;  %286 = vmatprep.subr.bf16.mxu1 %v290_v1  ;;  %v298_v9 = vld [vmem:[%s409_s0 + $0x38] sm:$0xff]   ;;  %v236_v10 = vld [vmem:[%s410_s2] ss:$0 sm:$0xff] }
   0x5   :  { %269 = vmatprep.mubr.msk.bf16.mxu0 %vm94_vm0, %v291_v2  ;;  %277 = vmatprep.mubr.msk.bf16.mxu1 %vm94_vm0, %v292_v3 }
   0x7   :  { %268 = vmatpush3.bf16.msra.mxu0 %v290_v1  ;;  %288 = vmatpush3.bf16.msra.mxu1 %v290_v1 }
   0xa   :  { %270 = vmatmul.mubr.msk.bf16.vlgmr.msra.gmra.mxu0 %vm94_vm0, %v293_v4  ;;  %278 = vmatmul.mubr.msk.bf16.vlgmr.msra.gmra.mxu1 %vm94_vm0, %v294_v5 }
   0xb   :  { %273 = vmatprep.mubr.msk.bf16.mxu0 %vm94_vm0, %v295_v6  ;;  %281 = vmatprep.mubr.msk.bf16.mxu1 %vm94_vm0, %v296_v7 }
  0x12   :  { %274 = vmatmul.mubr.msk.bf16.gmra.mxu0 %vm94_vm0, %v297_v8  ;;  %282 = vmatmul.mubr.msk.bf16.gmra.mxu1 %vm94_vm0, %v298_v9 }
  0xca   :  { %v271_v11 = vpop.f32.mrf.mxu0  ;;  %v279_v12 = vpop.f32.mrf.mxu1 }
  0xcb   :  { %v162_v13 = vadd.f32 %v271_v11, %v236_v10  ;;  %v194_v14 = vadd.f32 %v279_v12, %v236_v10 }
  0xcc   :  { %v153_v15 = vpop.f32.mrf.mxu0  ;;  %v185_v16 = vpop.f32.mrf.mxu1 }
  0xcd   :  { %218 = vst [vmem:[%s411_s3 + $0x10] sm:$0xff] %v162_v13  ;;  %226 = vst [vmem:[%s411_s3 + $0x50] sm:$0xff] %v194_v14  ;;  %v154_v17 = vadd.f32 %v236_v10, %v153_v15  ;;  %v186_v18 = vadd.f32 %v236_v10, %v185_v16 }
  0xce   :  { %v272_v19 = vpop.f32.mrf.mxu0  ;;  %v280_v20 = vpop.f32.mrf.mxu1 }
  0xcf   :  { %216 = vst [vmem:[%s411_s3] sm:$0xff] %v154_v17  ;;  %224 = vst [vmem:[%s411_s3 + $0x40] sm:$0xff] %v186_v18  ;;  %v165_v21 = vadd.f32 %v272_v19, %v236_v10  ;;  %v197_v22 = vadd.f32 %v280_v20, %v236_v10 }
  0xd0   :  { %v156_v23 = vpop.f32.mrf.mxu0  ;;  %v188_v24 = vpop.f32.mrf.mxu1 }
  0xd1   :  { %219 = vst [vmem:[%s411_s3 + $0x18] sm:$0xff] %v165_v21  ;;  %227 = vst [vmem:[%s411_s3 + $0x58] sm:$0xff] %v197_v22  ;;  %v157_v25 = vadd.f32 %v236_v10, %v156_v23  ;;  %v189_v26 = vadd.f32 %v236_v10, %v188_v24 }
  0xd2   :  { %v275_v27 = vpop.f32.mrf.mxu0  ;;  %v283_v28 = vpop.f32.mrf.mxu1 }
  0xd3   :  { %217 = vst [vmem:[%s411_s3 + $0x8] sm:$0xff] %v157_v25  ;;  %225 = vst [vmem:[%s411_s3 + $0x48] sm:$0xff] %v189_v26  ;;  %v178_v29 = vadd.f32 %v275_v27, %v236_v10  ;;  %v210_v30 = vadd.f32 %v283_v28, %v236_v10 }
  0xd4   :  { %v169_v31 = vpop.f32.mrf.mxu0  ;;  %v201_v32 = vpop.f32.mrf.mxu1 }
  0xd5   :  { %222 = vst [vmem:[%s411_s3 + $0x30] sm:$0xff] %v178_v29  ;;  %230 = vst [vmem:[%s411_s3 + $0x70] sm:$0xff] %v210_v30  ;;  %v170_v33 = vadd.f32 %v236_v10, %v169_v31  ;;  %v202_v34 = vadd.f32 %v236_v10, %v201_v32 }
  0xd6   :  { %v276_v35 = vpop.f32.mrf.mxu0  ;;  %v284_v36 = vpop.f32.mrf.mxu1 }
  0xd7   :  { %220 = vst [vmem:[%s411_s3 + $0x20] sm:$0xff] %v170_v33  ;;  %228 = vst [vmem:[%s411_s3 + $0x60] sm:$0xff] %v202_v34  ;;  %v181_v37 = vadd.f32 %v276_v35, %v236_v10  ;;  %v213_v38 = vadd.f32 %v284_v36, %v236_v10 }
  0xd8   :  { %v172_v39 = vpop.f32.mrf.mxu0  ;;  %v204_v40 = vpop.f32.mrf.mxu1 }
  0xd9   :  { %223 = vst [vmem:[%s411_s3 + $0x38] sm:$0xff] %v181_v37  ;;  %231 = vst [vmem:[%s411_s3 + $0x78] sm:$0xff] %v213_v38  ;;  %v173_v41 = vadd.f32 %v236_v10, %v172_v39  ;;  %v205_v42 = vadd.f32 %v236_v10, %v204_v40 }
  0xdb   :  { %221 = vst [vmem:[%s411_s3 + $0x28] sm:$0xff] %v173_v41  ;;  %229 = vst [vmem:[%s411_s3 + $0x68] sm:$0xff] %v205_v42 }

// kernel: forward.2
= control target key start
LH: loop header
LB: loop body
LE: loop exit
PB: predicated region body
PF: predicated region fallthrough
CT: control target
= control target key end

     0   :  { %s4961_s21 = smov 0   ;;  %s6292_s0 = inlined_call_operand.vmem [shape: bf16[2,9,9,8], index: 0, kind: input, shape index: {}]   ;;  %s6293_s1 = inlined_call_operand.vmem [shape: bf16[2,9,9,8], index: 1, kind: input, shape index: {}]   ;;  %s6294_s2 = inlined_call_operand.vmem [shape: bf16[2,9,9,8], index: 2, kind: input, shape index: {}]   ;;  %s6295_s3 = inlined_call_operand.vmem [shape: bf16[2,9,9,8], index: 3, kind: input, shape index: {}]   ;;  %s6296_s4 = inlined_call_operand.vmem [shape: bf16[9,8,32], index: 4, kind: input, shape index: {}]   ;;  %s6297_s5 = inlined_call_operand.vmem [shape: f32[1,32], index: 5, kind: input, shape index: {}]   ;;  %s6298_s6 = inlined_call_operand.vmem [shape: bf16[2,64,32], index: 6, kind: output, shape index: {}]  }
   0x1 LB: > { %s4045_s22 = sadd.s32 4294967295, %s4924_s21   ;;  %p4049_p0 = scmp.ge.s32.totalorder %s4924_s21, 1  ;;  %s4924_s21 = sphi %s4961_s21, %s16_s21  }
   0x2   : > { %p242_p1 = scmp.lt.s32.totalorder %s4924_s21, 3 }
   0x4   : > { %p243_p2 = pnand %p4049_p0, %p242_p1 }
   0x6   : > { %246 = sbr.rel (%p243_p2) target bundleno = 531 (0x213), region = 44 }
   0xb   : > { %v4972_v0 = vld [vmem:[%s6296_s4 + $0x4] sm:$0xf]  ;;  %vm435_vm0 = vcmask 1043456   ;;  %v4977_v1 = vld [vmem:[%s6296_s4] sm:$0xf]  ;;  %p287_p3 = scmp.lt.s32.totalorder %s4045_s22, 1 }
   0xc   : > { %4832 = vmatprep.subr.msk.bf16.mxu0 %vm435_vm0, %v4972_v0  ;;  %v4983_v2 = vsel %vm435_vm0, %v4972_v0, 0  ;;  %4833 = vmatprep.subr.msk.bf16.mxu1 %vm435_vm0, %v4977_v1  ;;  %v4989_v3 = vsel %vm435_vm0, %v4977_v1, 0  ;;  %v4994_v4 = vld [vmem:[%s6296_s4 + $0x8] sm:$0xf]  ;;  %v5003_v5 = vld [vmem:[%s6296_s4 + $0xc] sm:$0xf] }
   0xd   : > { %6361 = vst [vmem:[#allocation2_spill] sm:$0xff] %v4989_v3  ;;  %4473 = vmatpush3.bf16.msra.mxu0 %v4983_v2  ;;  %4483 = vmatpush3.bf16.msra.mxu1 %v4989_v3  ;;  %s6525_s22 = smov (!%p287_p3, %s4045_s22), 1  ;;  %6362 = vst [vmem:[#allocation3_spill] sm:$0xff] %v5003_v5  ;;  %v5012_v6 = vld [vmem:[%s6296_s4 + $0x10] sm:$0xf]  ;;  %vm422_vm1 = vcmask 64512  }
   0xe   : > { %4834 = vmatprep.subr.msk.bf16.mxu0 %vm435_vm0, %v4994_v4  ;;  %4835 = vmatprep.subr.msk.bf16.mxu1 %vm435_vm0, %v5003_v5  ;;  %6363 = vst [vmem:[#allocation4_spill] sm:$0xff] %v5012_v6  ;;  %s5015_s9 = smul.u32 72, %s6525_s22  ;;  %v5020_v7 = vld [vmem:[%s6296_s4 + $0x14] sm:$0xf]  ;;  %v5025_v8 = vld [vmem:[%s6296_s4 + $0x18] sm:$0xf] }
   0xf   : > { %v5029_v9 = vsel %vm435_vm0, %v4994_v4, 0  ;;  %v5033_v10 = vsel %vm435_vm0, %v5003_v5, 0  ;;  %v5038_v11 = vld [vmem:[%s6296_s4 + $0x1c] sm:$0xf]  ;;  %v5054_v12 = vsel %vm435_vm0, %v5012_v6, 0  ;;  %v5058_v13 = vsel %vm435_vm0, %v5020_v7, 0 }
  0x10   : > { %6364 = vst [vmem:[#allocation5_spill] sm:$0xff] %v5029_v9  ;;  %6365 = vst [vmem:[#allocation6_spill] sm:$0xff] %v5033_v10  ;;  %s5044_s18 = scalar_lea.vmem %s6293_s1, %s5015_s9  ;;  %s5050_s23 = scalar_lea.vmem %s6292_s0, %s5015_s9  ;;  %v5062_v14 = vsel %vm435_vm0, %v5025_v8, 0  ;;  %v5066_v15 = vsel %vm435_vm0, %v5038_v11, 0  ;;  %v5094_v38 = vld [vmem:[%s6296_s4 + $0x20] sm:$0xf] }
  0x11   : > { %6366 = vst [vmem:[#allocation7_spill] sm:$0xff] %v5054_v12  ;;  %6367 = vst [vmem:[#allocation8_spill] sm:$0xff] %v5058_v13  ;;  %v331_v16 = vld [vmem:[%s5044_s18] sm:$0xf]  ;;  %v5070_v17 = vld [vmem:[%s5044_s18 + $0x8] sm:$0xf]  ;;  %s5170_s28 = scalar_lea.vmem %s6294_s2, %s5015_s9  ;;  %s5310_s7 = scalar_lea.vmem %s6295_s3, %s5015_s9 }
  0x12   : > { %6368 = vst [vmem:[#allocation9_spill] sm:$0xff] %v5062_v14  ;;  %6369 = vst [vmem:[#allocation10_spill] sm:$0xff] %v5066_v15  ;;  %v313_v18 = vld [vmem:[%s5050_s23] sm:$0xf]  ;;  %v5074_v19 = vcombine.low %v331_v16, %v5070_v17  ;;  %v1673_v20 = vshrl.u32 %v331_v16, 16  ;;  %v1676_v21 = vshll.u32 %v331_v16, 16 }
  0x13   : > { %v1687_v22 = vshrl.u32 %v5070_v17, 16  ;;  %v5078_v23 = vld [vmem:[%s5050_s23 + $0x8] sm:$0xf]  ;;  %v1690_v24 = vshll.u32 %v5070_v17, 16  ;;  %v608_v26 = vshrl.u32 %v313_v18, 16  ;;  %v611_v27 = vshll.u32 %v313_v18, 16 }
  0x14   : > { %6370 = vst [vmem:[#allocation11_spill] sm:$0xff] %v5074_v19  ;;  %v4072_v25 = vcombine.low %v313_v18, %v5078_v23  ;;  %v5083_v28 = vld [vmem:[%s5044_s18 + $0x10] sm:$0xf]  ;;  %4474 = vmatprep.mubr.msk.bf16.mxu0 %vm422_vm1, %v5074_v19  ;;  %v1675_v29 = vrot.slane %v1673_v20, 4  ;;  %v1678_v30 = vrot.slane %v1676_v21, 5  ;;  %v622_v32 = vshrl.u32 %v5078_v23, 16 }
  0x15   : > { %v1689_v31 = vrot.slane %v1687_v22, 4  ;;  %v337_v33 = vld [vmem:[%s5044_s18 + $0x18] sm:$0xf]  ;;  %v1692_v34 = vrot.slane %v1690_v24, 5  ;;  %v610_v35 = vrot.slane %v608_v26, 4  ;;  %v613_v36 = vrot.slane %v611_v27, 5 }
  0x16   : > { %4484 = vmatprep.mubr.msk.bf16.mxu1 %vm422_vm1, %v4072_v25  ;;  %v625_v37 = vshll.u32 %v5078_v23, 16  ;;  %6371 = vst [vmem:[#allocation12_spill] sm:$0xff] %v5094_v38  ;;  %v1679_v39 = vor.u32 %v1678_v30, %v1675_v29  ;;  %v624_v40 = vrot.slane %v622_v32, 4  ;;  %v5097_v41 = vcombine.low %v5083_v28, %v337_v33  ;;  %v5102_v46 = vld [vmem:[%s5050_s23 + $0x10] sm:$0xf]  ;;  %s4283_s30 = sshll.u32 %s6525_s22, 5 }
  0x17   : > { %v1701_v42 = vshrl.u32 %v5083_v28, 16  ;;  %v1693_v43 = vor.u32 %v1692_v34, %v1689_v31  ;;  %v1704_v45 = vshll.u32 %v5083_v28, 16  ;;  %v5105_v47 = vld [vmem:[%s5050_s23 + $0x18] sm:$0xf]  ;;  %v1715_v49 = vshrl.u32 %v337_v33, 16  ;;  %s6260_s22 = scalar_lea.vmem %s6298_s6, %s4283_s30 }
  0x18   : > { %6372 = vst [vmem:[#allocation13_spill] sm:$0xff] %v5097_v41  ;;  %v627_v44 = vrot.slane %v625_v37, 5  ;;  %4475 = vmatmul.mubr.msk.bf16.vlgmr.msra.gmra.mxu0 %vm422_vm1, %v5097_v41  ;;  %v1718_v50 = vshll.u32 %v337_v33, 16  ;;  %v5111_v51 = vsel %vm435_vm0, %v5094_v38, 0  ;;  %v5113_v52 = vrot.slane %v1679_v39, 4 }
  0x19   : > { %v1703_v48 = vrot.slane %v1701_v42, 4  ;;  %6373 = vst [vmem:[#allocation14_spill] sm:$0xff] %v5111_v51  ;;  %v614_v53 = vor.u32 %v613_v36, %v610_v35  ;;  %v1706_v55 = vrot.slane %v1704_v45, 5  ;;  %4493 = vmatpush3.bf16.msra.mxu0 %v5029_v9  ;;  %v5117_v56 = vld [vmem:[%s5044_s18 + $0x20] sm:$0xf]  ;;  %v1717_v58 = vrot.slane %v1715_v49, 4 }
  0x1a   : > { %v628_v54 = vor.u32 %v627_v44, %v624_v40  ;;  %v5120_v57 = vld [vmem:[%s5044_s18 + $0x28] sm:$0xf]  ;;  %v1720_v59 = vrot.slane %v1718_v50, 5  ;;  %v4073_v60 = vcombine.low %v5102_v46, %v5105_v47  ;;  %v636_v61 = vshrl.u32 %v5102_v46, 16  ;;  %4836 = vmatprep.subr.msk.bf16.mxu0 %vm435_vm0, %v5012_v6  ;;  %v5132_v20 = vld [vmem:[%s5050_s23 + $0x20] sm:$0xf] }
  0x1b   : > { %vm604_vm2 = vsmask.f32 3328  ;;  %vm605_vm3 = vsmask.f32 7440  ;;  %v5127_v62 = vrot.slane %v1693_v43, 4  ;;  %v1707_v63 = vor.u32 %v1706_v55, %v1703_v48 }
  0x1c   : > { %v639_v16 = vshll.u32 %v5102_v46, 16  ;;  %v650_v18 = vshrl.u32 %v5105_v47, 16  ;;  %v1721_v21 = vor.u32 %v1720_v59, %v1717_v58  ;;  %4485 = vmatmul.mubr.msk.bf16.vlgmr.msra.gmra.mxu1 %vm422_vm1, %v4073_v60  ;;  %v638_v22 = vrot.slane %v636_v61, 4  ;;  %v5141_v26 = vld [vmem:[%s5050_s23 + $0x28] sm:$0xf]  ;;  %vm5218_vm4 = vmor %vm604_vm2, %vm605_vm3 }
  0x1d   : > { %v653_v24 = vshll.u32 %v5105_v47, 16  ;;  %v5138_v25 = vcombine.low %v5117_v56, %v5120_v57  ;;  %v5144_v27 = vld [vmem:[%s5044_s18 + $0x30] sm:$0xf]  ;;  %v5146_v29 = vrot.slane %v614_v53, 4  ;;  %v5148_v30 = vrot.slane %v628_v54, 4  ;;  %4503 = vmatpush3.bf16.msra.mxu1 %v5033_v10 }
  0x1e   : > { %v641_v31 = vrot.slane %v639_v16, 5  ;;  %v652_v32 = vrot.slane %v650_v18, 4  ;;  %v5152_v34 = vld [vmem:[%s5044_s18 + $0x38] sm:$0xf]  ;;  %v5154_v35 = vrot.slane %v1707_v63, 4  ;;  %v5156_v36 = vrot.slane %v1721_v21, 4  ;;  %4837 = vmatprep.subr.msk.bf16.mxu1 %vm435_vm0, %v5020_v7 }
  0x1f   : > { %6374 = vst [vmem:[#allocation15_spill] sm:$0xff] %v5138_v25  ;;  %v655_v37 = vrot.slane %v653_v24, 5  ;;  %4478 = vmatprep.mubr.msk.bf16.mxu0 %vm422_vm1, %v5138_v25  ;;  %v5161_v39 = vcombine.low %v337_v33, %v5117_v56  ;;  %v5164_v40 = vld [vmem:[%s5050_s23 + $0x30] sm:$0xf]  ;;  %v4074_v33 = vcombine.low %v5132_v20, %v5141_v26  ;;  %v5179_v45 = vld [vmem:[%s5050_s23 + $0x38] sm:$0xf]  ;;  %v5191_v60 = vcombine.low %v5144_v27, %v5152_v34 }
  0x20   : > { %v642_v42 = vor.u32 %v641_v31, %v638_v22  ;;  %v314_v48 = vld [vmem:[%s5050_s23 + $0x4] sm:$0x1]  ;;  %v664_v7 = vshrl.u32 %v5132_v20, 16  ;;  %v316_v54 = vld [vmem:[%s5050_s23 + $0xc] sm:$0x1]  ;;  %v667_v58 = vshll.u32 %v5132_v20, 16  ;;  %v5197_v18 = vcombine.low %v5105_v47, %v5132_v20 }
  0x21   : > { %v656_v49 = vor.u32 %v655_v37, %v652_v32  ;;  %4488 = vmatprep.mubr.msk.bf16.mxu1 %vm422_vm1, %v4074_v33  ;;  %v678_v59 = vshrl.u32 %v5141_v26, 16  ;;  %6375 = vst [vmem:[#allocation16_spill] sm:$0xff] %v5191_v60  ;;  %v349_v61 = vld [vmem:[%s5170_s28] sm:$0xf]  ;;  %v681_v16 = vshll.u32 %v5141_v26, 16  ;;  %4479 = vmatmul.mubr.msk.bf16.gmra.mxu0 %vm422_vm1, %v5191_v60  ;;  %v4075_v37 = vcombine.low %v5164_v40, %v5179_v45 }
  0x22   : > { %v643_v55 = vrot.slane %v642_v42, 4  ;;  %6376 = vst [vmem:[#allocation17_spill] sm:$0xff] %v5197_v18  ;;  %v5201_v22 = vld [vmem:[%s5170_s28 + $0x8] sm:$0xf]  ;;  %v318_v42 = vld [vmem:[%s5050_s23 + $0x14] sm:$0x1] }
  0x23   : > { %v657_v63 = vrot.slane %v656_v49, 4  ;;  %6377 = vst [vmem:[#allocation18_spill] sm:$0xff] %v5201_v22  ;;  %v617_v33 = vshll.u32 %v314_v48, 16  ;;  %v631_v49 = vshll.u32 %v316_v54, 16  ;;  %v320_v21 = vld [vmem:[%s5050_s23 + $0x1c] sm:$0x1]  ;;  %v5223_v31 = vcombine.low %v349_v61, %v5201_v22 }
  0x24   : > { %4489 = vmatmul.mubr.msk.bf16.gmra.mxu1 %vm422_vm1, %v4075_v37  ;;  %v1036_v53 = vshrl.u32 %v349_v61, 16  ;;  %v1039_v50 = vshll.u32 %v349_v61, 16  ;;  %v5226_v44 = vld [vmem:[%s5170_s28 + $0x10] sm:$0xf]  ;;  %v709_v48 = vshll.u32 %v5179_v45, 16  ;;  %v645_v43 = vshll.u32 %v318_v42, 16 }
  0x25   : > { %6380 = vst [vmem:[#allocation19_spill] sm:$0xff] %v5223_v31  ;;  %6381 = vst [vmem:[#allocation20_spill] sm:$0xff] %v5226_v44  ;;  %v619_v54 = vrot.slane %v617_v33, 5  ;;  %v633_v37 = vrot.slane %v631_v49, 5  ;;  %v5230_v24 = vld [vmem:[%s5170_s28 + $0x18] sm:$0xf]  ;;  %4504 = vmatprep.mubr.msk.bf16.mxu1 %vm422_vm1, %v5223_v31 }
  0x26   : > { %6382 = vst [vmem:[#allocation21_spill] sm:$0xff] %v5230_v24  ;;  %v5234_v20 = vrot.slane %v1036_v53, 4  ;;  %v659_v60 = vshll.u32 %v320_v21, 16  ;;  %v5246_v49 = vrot.slane %v1039_v50, 5  ;;  %v647_v31 = vrot.slane %v645_v43, 5 }
  0x27   : > { %v620_v33 = vsel %vm5218_vm4, %v5146_v29, %v619_v54  ;;  %v5244_v42 = vsel %vm5218_vm4, %v5148_v30, %v633_v37  ;;  %v322_v25 = vld [vmem:[%s5050_s23 + $0x24] sm:$0x1]  ;;  %v324_v53 = vld [vmem:[%s5050_s23 + $0x2c] sm:$0x1]  ;;  %v5255_v21 = vcombine.low %v5226_v44, %v5230_v24  ;;  %v5259_v54 = vld [vmem:[%s5170_s28 + $0x20] sm:$0xf] }
  0x28   : > { %v5251_v10 = vcombine.low %v620_v33, %v5244_v42  ;;  %v661_v61 = vrot.slane %v659_v60, 5  ;;  %6385 = vst [vmem:[#allocation24_spill] sm:$0xff] %v5259_v54  ;;  %v5262_v30 = vld [vmem:[%s5170_s28 + $0x28] sm:$0xf]  ;;  %v5266_v43 = vsel %vm5218_vm4, %v643_v55, %v647_v31  ;;  %v666_v37 = vrot.slane %v664_v7, 4 }
  0x29   : > { %6384 = vst [vmem:[#allocation23_spill] sm:$0xff] %v5255_v21  ;;  %v669_v33 = vrot.slane %v667_v58, 5  ;;  %v673_v29 = vshll.u32 %v322_v25, 16  ;;  %v680_v47 = vrot.slane %v678_v59, 4  ;;  %v683_v41 = vrot.slane %v681_v16, 5 }
  0x2a   : > { %6383 = vst [vmem:[#allocation22_spill] sm:$0xff] %v5251_v10  ;;  %4494 = vmatprep.mubr.msk.bf16.mxu0 %vm422_vm1, %v5251_v10  ;;  %v662_v60 = vsel %vm5218_vm4, %v657_v63, %v661_v61  ;;  %v687_v55 = vshll.u32 %v324_v53, 16  ;;  %v5278_v7 = vcombine.low %v5259_v54, %v5262_v30  ;;  %v326_v58 = vld [vmem:[%s5050_s23 + $0x34] sm:$0x1]  ;;  %v328_v16 = vld [vmem:[%s5050_s23 + $0x3c] sm:$0x1] }
  0x2b   : > { %v5274_v19 = vcombine.low %v5266_v43, %v662_v60  ;;  %v670_v6 = vor.u32 %v669_v33, %v666_v37  ;;  %v675_v59 = vrot.slane %v673_v29, 5  ;;  %v684_v63 = vor.u32 %v683_v41, %v680_v47  ;;  %v5292_v50 = vld [vmem:[%s5170_s28 + $0x30] sm:$0xf]  ;;  %v5304_v37 = vld [vmem:[%s5170_s28 + $0x38] sm:$0xf] }
  0x2c   : > { %6387 = vst [vmem:[#allocation26_spill] sm:$0xff] %v5278_v7  ;;  %4505 = vmatmul.mubr.msk.bf16.vlgmr.msra.gmra.mxu1 %vm422_vm1, %v5255_v21  ;;  %v689_v53 = vrot.slane %v687_v55, 5  ;;  %v6388_v47 = vshrl.u32 %v5164_v40, 16  ;;  %6390 = vst [vmem:[#allocation27_spill] sm:$0xff] %v5304_v37  ;;  %v701_v33 = vshll.u32 %v326_v58, 16  ;;  %v6391_v41 = vshrl.u32 %v5179_v45, 16 }
  0x2d   : > { %6386 = vst [vmem:[#allocation25_spill] sm:$0xff] %v5274_v19  ;;  %4495 = vmatmul.mubr.msk.bf16.vlgmr.msra.gmra.mxu0 %vm422_vm1, %v5274_v19  ;;  %4523 = vmatpush3.bf16.msra.mxu1 %v5058_v13  ;;  %v671_v61 = vrot.slane %v670_v6, 4  ;;  %v685_v29 = vrot.slane %v684_v63, 4  ;;  %v6389_v6 = vshll.u32 %v5164_v40, 16  ;;  %v5334_v13 = vld [vmem:[%s5310_s7 + $0x8] sm:$0xf] }
  0x2e   : > { %4513 = vmatpush3.bf16.msra.mxu0 %v5054_v12  ;;  %4508 = vmatprep.mubr.msk.bf16.mxu1 %vm422_vm1, %v5278_v7  ;;  %v694_v25 = vrot.slane %v6388_v47, 4  ;;  %v708_v31 = vrot.slane %v6391_v41, 4  ;;  %v711_v47 = vrot.slane %v709_v48, 5  ;;  %v367_v41 = vld [vmem:[%s5310_s7] sm:$0xf]  ;;  %v6403_v3 = vshrl.u32 %v5230_v24, 16 }
  0x2f   : > { %v697_v55 = vrot.slane %v6389_v6, 5  ;;  %v676_v63 = vsel %vm5218_vm4, %v671_v61, %v675_v59  ;;  %4838 = vmatprep.subr.msk.bf16.mxu0 %vm435_vm0, %v5025_v8  ;;  %4839 = vmatprep.subr.msk.bf16.mxu1 %vm435_vm0, %v5038_v11  ;;  %v5322_v6 = vsel %vm5218_vm4, %v685_v29, %v689_v53  ;;  %v715_v59 = vshll.u32 %v328_v16, 16  ;;  %v350_v16 = vld [vmem:[%s5170_s28 + $0x4] sm:$0x1]  ;;  %v352_v53 = vld [vmem:[%s5170_s28 + $0xc] sm:$0x1] }
  0x30   : > { %v5326_v58 = vcombine.low %v676_v63, %v5322_v6  ;;  %v703_v61 = vrot.slane %v701_v33, 5  ;;  %v712_v48 = vor.u32 %v711_v47, %v708_v31  ;;  %v5330_v8 = vcombine.low %v5292_v50, %v5304_v37  ;;  %v5366_v33 = vld [vmem:[%s5310_s7 + $0x18] sm:$0xf]  ;;  %v356_v9 = vld [vmem:[%s5170_s28 + $0x1c] sm:$0x1] }
  0x31   : > { %v698_v21 = vor.u32 %v697_v55, %v694_v25  ;;  %v5336_v11 = vcombine.low %v662_v60, %v676_v63  ;;  %v717_v25 = vrot.slane %v715_v59, 5  ;;  %v2028_v63 = vshrl.u32 %v367_v41, 16  ;;  %v5363_v55 = vld [vmem:[%s5310_s7 + $0x10] sm:$0xf] }
  0x32   : > { %6392 = vst [vmem:[#allocation28_spill] sm:$0xff] %v5326_v58  ;;  %6393 = vst [vmem:[#allocation29_spill] sm:$0xff] %v5330_v8  ;;  %4498 = vmatprep.mubr.msk.bf16.mxu0 %vm422_vm1, %v5326_v58  ;;  %v713_v31 = vrot.slane %v712_v48, 4  ;;  %v2031_v59 = vshll.u32 %v367_v41, 16  ;;  %v5358_v47 = vcombine.low %v367_v41, %v5334_v13  ;;  %v6398_v41 = vshrl.u32 %v5201_v22, 16 }
  0x33   : > { %6394 = vst [vmem:[#allocation30_spill] sm:$0xff] %v5336_v11  ;;  %v699_v29 = vrot.slane %v698_v21, 4  ;;  %v1059_v58 = vshll.u32 %v352_v53, 16  ;;  %v5382_v19 = vrot.slane %v2028_v63, 4  ;;  %vm3945_vm5 = vcmask 257024  }
  0x34   : > { %4509 = vmatmul.mubr.msk.bf16.gmra.mxu1 %vm422_vm1, %v5330_v8  ;;  %v5355_v48 = vsel %vm5218_vm4, %v713_v31, %v717_v25  ;;  %6396 = vst [vmem:[#allocation32_spill] sm:$0xff] %v5358_v47  ;;  %v1052_v31 = vrot.slane %v6398_v41, 4  ;;  %v354_v8 = vld [vmem:[%s5170_s28 + $0x14] sm:$0x1]  ;;  %v5384_v7 = vrot.slane %v2031_v59, 5  ;;  %v5388_v25 = vcombine.low %v5363_v55, %v5366_v33 }
  0x35   : > { %v5347_v60 = vsel %vm5218_vm4, %v699_v29, %v703_v61  ;;  %6395 = vst [vmem:[#allocation31_spill] sm:$0xff] %v5355_v48  ;;  %v1042_v61 = vor.u32 %v5246_v49, %v5234_v20  ;;  %v1045_v29 = vshll.u32 %v350_v16, 16  ;;  %v6399_v49 = vshll.u32 %v5201_v22, 16  ;;  %v5392_v41 = vld [vmem:[%s5310_s7 + $0x20] sm:$0xf] }
  0x36   : > { %v5370_v21 = vcombine.low %v5347_v60, %v5355_v48  ;;  %6400 = vst [vmem:[#allocation34_spill] sm:$0xff] %v5388_v25  ;;  %v5399_v59 = vld [vmem:[%s5310_s7 + $0x28] sm:$0xf]  ;;  %v6401_v22 = vshrl.u32 %v5226_v44, 16  ;;  %v6402_v48 = vshll.u32 %v5226_v44, 16  ;;  %v1073_v5 = vshll.u32 %v354_v8, 16 }
  0x37   : > { %v1043_v12 = vrot.slane %v1042_v61, 4  ;;  %v1047_v20 = vrot.slane %v1045_v29, 5  ;;  %v1055_v16 = vrot.slane %v6399_v49, 5  ;;  %v1061_v29 = vrot.slane %v1059_v58, 5  ;;  %v358_v8 = vld [vmem:[%s5170_s28 + $0x24] sm:$0x1] }
  0x38   : > { %6397 = vst [vmem:[#allocation33_spill] sm:$0xff] %v5370_v21  ;;  %4499 = vmatmul.mubr.msk.bf16.gmra.mxu0 %vm422_vm1, %v5370_v21  ;;  %v1066_v21 = vrot.slane %v6401_v22, 4  ;;  %v1069_v61 = vrot.slane %v6402_v48, 5  ;;  %v1087_v49 = vshll.u32 %v356_v9, 16  ;;  %v1075_v22 = vrot.slane %v1073_v5, 5 }
  0x39   : > { %4514 = vmatprep.mubr.msk.bf16.mxu0 %vm422_vm1, %v5358_v47  ;;  %v1056_v53 = vor.u32 %v1055_v16, %v1052_v31  ;;  %v1080_v47 = vrot.slane %v6403_v3, 4  ;;  %v1048_v58 = vsel %vm5218_vm4, %v1043_v12, %v1047_v20  ;;  %v6404_v16 = vshll.u32 %v5230_v24, 16  ;;  %v362_v24 = vld [vmem:[%s5170_s28 + $0x34] sm:$0x1] }
  0x3a   : > { %v1070_v10 = vor.u32 %v1069_v61, %v1066_v21  ;;  %v5414_v48 = vcombine.low %v5392_v41, %v5399_v59  ;;  %v1089_v20 = vrot.slane %v1087_v49, 5  ;;  %v5429_v61 = vcombine.low %v5366_v33, %v5392_v41  ;;  %v5451_v21 = vld [vmem:[%s5310_s7 + $0x38] sm:$0xf] }
  0x3b   : > { %v1057_v31 = vrot.slane %v1056_v53, 4  ;;  %v1083_v63 = vrot.slane %v6404_v16, 5  ;;  %v360_v16 = vld [vmem:[%s5170_s28 + $0x2c] sm:$0x1]  ;;  %v5436_v53 = vld [vmem:[%s5310_s7 + $0x30] sm:$0xf] }
  0x3c   : > { %v1071_v5 = vrot.slane %v1070_v10, 4  ;;  %6405 = vst [vmem:[#allocation35_spill] sm:$0xff] %v5429_v61 }
  0x3d   : > { %v5419_v3 = vsel %vm5218_vm4, %v1057_v31, %v1061_v29  ;;  %v1084_v12 = vor.u32 %v1083_v63, %v1080_v47  ;;  %v6406_v29 = vshrl.u32 %v5259_v54, 16  ;;  %v6407_v47 = vshll.u32 %v5259_v54, 16 }
  0x3e   : > { %v5424_v9 = vcombine.low %v1048_v58, %v5419_v3  ;;  %v1101_v63 = vshll.u32 %v358_v8, 16  ;;  %v5444_v10 = vsel %vm5218_vm4, %v1071_v5, %v1075_v22  ;;  %v6408_v58 = vshrl.u32 %v5262_v30, 16 }
  0x3f   : > { %v1085_v11 = vrot.slane %v1084_v12, 4  ;;  %v1094_v31 = vrot.slane %v6406_v29, 4  ;;  %v1097_v49 = vrot.slane %v6407_v47, 5  ;;  %v6409_v29 = vshll.u32 %v5262_v30, 16 }
  0x40   : > { %4524 = vmatprep.mubr.msk.bf16.mxu1 %vm422_vm1, %v5424_v9  ;;  %4515 = vmatmul.mubr.msk.bf16.vlgmr.msra.gmra.mxu0 %vm422_vm1, %v5388_v25  ;;  %v1108_v12 = vrot.slane %v6408_v58, 4  ;;  %v1115_v8 = vshll.u32 %v360_v16, 16  ;;  %v1103_v54 = vrot.slane %v1101_v63, 5  ;;  %v364_v25 = vld [vmem:[%s5170_s28 + $0x3c] sm:$0x1] }
  0x41   : > { %v1111_v47 = vrot.slane %v6409_v29, 5  ;;  %v1090_v61 = vsel %vm5218_vm4, %v1085_v11, %v1089_v20  ;;  %4533 = vmatpush3.bf16.msra.mxu0 %v5062_v14  ;;  %4518 = vmatprep.mubr.msk.bf16.mxu0 %vm422_vm1, %v5414_v48  ;;  %v1098_v5 = vor.u32 %v1097_v49, %v1094_v31  ;;  %v5469_v20 = vcombine.low %v5436_v53, %v5451_v21 }
  0x42   : > { %v5461_v58 = vcombine.low %v5444_v10, %v1090_v61  ;;  %v1117_v44 = vrot.slane %v1115_v8, 5  ;;  %4840 = vmatprep.subr.msk.bf16.mxu0 %vm435_vm0, %v5094_v38  ;;  %v6413_v8 = vshll.u32 %v5292_v50, 16  ;;  %v6414_v49 = vshrl.u32 %v5304_v37, 16 }
  0x43   : > { %v1112_v29 = vor.u32 %v1111_v47, %v1108_v12  ;;  %v1099_v11 = vrot.slane %v1098_v5, 4  ;;  %6411 = vst [vmem:[#allocation37_spill] sm:$0xff] %v5469_v20  ;;  %v6412_v12 = vshrl.u32 %v5292_v50, 16  ;;  %v1129_v5 = vshll.u32 %v362_v24, 16 }
  0x44   : > { %6410 = vst [vmem:[#allocation36_spill] sm:$0xff] %v5461_v58  ;;  %4525 = vmatmul.mubr.msk.bf16.vlgmr.msra.gmra.mxu1 %vm422_vm1, %v5461_v58  ;;  %v1125_v16 = vrot.slane %v6413_v8, 5  ;;  %v1136_v22 = vrot.slane %v6414_v49, 4  ;;  %v6415_v38 = vshll.u32 %v5304_v37, 16  ;;  %v1143_v14 = vshll.u32 %v364_v25, 16 }
  0x45   : > { %v1113_v63 = vrot.slane %v1112_v29, 4  ;;  %v1122_v47 = vrot.slane %v6412_v12, 4  ;;  %4543 = vmatpush3.bf16.msra.mxu1 %v5066_v15  ;;  %v1104_v31 = vsel %vm5218_vm4, %v1099_v11, %v1103_v54  ;;  %v1131_v58 = vrot.slane %v1129_v5, 5  ;;  %v347_v25 = vld [vmem:[%s5044_s18 + $0x40] sm:$0xf] }
  0x46   : > { %v1139_v29 = vrot.slane %v6415_v38, 5  ;;  %v5490_v8 = vcombine.low %v1090_v61, %v1104_v31  ;;  %4841 = vmatprep.subr.msk.bf16.mxu1 %vm435_vm0, %v4972_v0  ;;  %v1145_v49 = vrot.slane %v1143_v14, 5  ;;  %v5499_v38 = vcombine.low %v5078_v23, %v5102_v46 }
  0x47   : > { %v5488_v12 = vsel %vm5218_vm4, %v1113_v63, %v1117_v44  ;;  %v1126_v24 = vor.u32 %v1125_v16, %v1122_v47  ;;  %v329_v44 = vld [vmem:[%s5050_s23 + $0x40] sm:$0xf]  ;;  %v5509_v14 = vcombine.low %v5070_v17, %v5083_v28  ;;  %v5518_v46 = vcombine.low %v5141_v26, %v5164_v40  ;;  %v332_v47 = vld [vmem:[%s5044_s18 + $0x4] sm:$0x1] }
  0x48   : > { %6416 = vst [vmem:[#allocation38_spill] sm:$0xff] %v5490_v8  ;;  %v5495_v54 = vcombine.low %v1104_v31, %v5488_v12  ;;  %v1140_v11 = vor.u32 %v1139_v29, %v1136_v22  ;;  %6417 = vst [vmem:[#allocation39_spill] sm:$0xff] %v5499_v38  ;;  %4519 = vmatmul.mubr.msk.bf16.gmra.mxu0 %vm422_vm1, %v5469_v20  ;;  %v330_v22 = vld [vmem:[%s5050_s23 + $0x44] sm:$0x1]  ;;  %v1436_v31 = vshrl.u32 %v329_v44, 16  ;;  %v1439_v63 = vshll.u32 %v329_v44, 16 }
  0x49   : > { %v1127_v16 = vrot.slane %v1126_v24, 4  ;;  %4534 = vmatprep.mubr.msk.bf16.mxu0 %vm422_vm1, %v5499_v38  ;;  %6418 = vst [vmem:[#allocation40_spill] sm:$0xff] %v5518_v46  ;;  %v5527_v28 = vcombine.low %v5120_v57, %v5144_v27  ;;  %v5530_v5 = vcombine.low %v5179_v45, %v329_v44  ;;  %v2383_v29 = vshrl.u32 %v347_v25, 16  ;;  %v334_v24 = vld [vmem:[%s5044_s18 + $0xc] sm:$0x1] }
  0x4a   : > { %4528 = vmatprep.mubr.msk.bf16.mxu1 %vm422_vm1, %v5495_v54  ;;  %v1141_v23 = vrot.slane %v1140_v11, 4  ;;  %v336_v11 = vld [vmem:[%s5044_s18 + $0x14] sm:$0x1]  ;;  %v1438_v40 = vrot.slane %v1436_v31, 4  ;;  %v1441_v0 = vrot.slane %v1439_v63, 5  ;;  %v2386_v61 = vshll.u32 %v347_v25, 16 }
  0x4b   : > { %v5523_v17 = vsel %vm5218_vm4, %v1127_v16, %v1131_v58  ;;  %6419 = vst [vmem:[#allocation41_spill] sm:$0xff] %v5530_v5  ;;  %v338_v58 = vld [vmem:[%s5044_s18 + $0x1c] sm:$0x1]  ;;  %v5544_v8 = vcombine.low %v5152_v34, %v347_v25  ;;  %v5546_v45 = vrot.slane %v2383_v29, 4  ;;  %v5550_v44 = vcombine.low %v5244_v42, %v5266_v43  ;;  %v340_v63 = vld [vmem:[%s5044_s18 + $0x24] sm:$0x1] }
  0x4c   : > { %v5536_v26 = vsel %vm5218_vm4, %v1141_v23, %v1145_v49  ;;  %v1442_v37 = vor.u32 %v1441_v0, %v1438_v40  ;;  %v1445_v49 = vshll.u32 %v330_v22, 16  ;;  %v1682_v23 = vshll.u32 %v332_v47, 16 }
  0x4d   : > { %6420 = vst [vmem:[#allocation42_spill] sm:$0xff] %v5536_v26  ;;  %v5541_v16 = vcombine.low %v5523_v17, %v5536_v26  ;;  %v1696_v31 = vshll.u32 %v334_v24, 16  ;;  %v1710_v38 = vshll.u32 %v336_v11, 16  ;;  %v1724_v26 = vshll.u32 %v338_v58, 16  ;;  %v6439_v58 = vld [vmem:[#allocation30_spill] sm:$0xff] }
  0x4e   : > { %v6421_v15 = vshrl.u32 %v5117_v56, 16  ;;  %v6422_v29 = vshll.u32 %v5117_v56, 16  ;;  %v5561_v42 = vrot.slane %v2386_v61, 5  ;;  %v5565_v43 = vcombine.low %v5322_v6, %v5347_v60 }
  0x4f   : > { %4529 = vmatmul.mubr.msk.bf16.gmra.mxu1 %vm422_vm1, %v5541_v16  ;;  %v1684_v0 = vrot.slane %v1682_v23, 5  ;;  %v1698_v22 = vrot.slane %v1696_v31, 5  ;;  %v1726_v47 = vrot.slane %v1724_v26, 5  ;;  %v1738_v24 = vshll.u32 %v340_v63, 16  ;;  %v344_v26 = vld [vmem:[%s5044_s18 + $0x34] sm:$0x1] }
  0x50   : > { %v1731_v25 = vrot.slane %v6421_v15, 4  ;;  %v1734_v20 = vrot.slane %v6422_v29, 5  ;;  %4544 = vmatprep.mubr.msk.bf16.mxu1 %vm422_vm1, %v5509_v14  ;;  %4535 = vmatmul.mubr.msk.bf16.vlgmr.msra.gmra.mxu0 %vm422_vm1, %v5197_v18  ;;  %v1712_v15 = vrot.slane %v1710_v38, 5  ;;  %v5572_v61 = vrot.slane %v1442_v37, 4  ;;  %v342_v38 = vld [vmem:[%s5044_s18 + $0x2c] sm:$0x1] }
  0x51   : > { %4553 = vmatpush3.bf16.msra.mxu0 %v5111_v51  ;;  %4538 = vmatprep.mubr.msk.bf16.mxu0 %vm422_vm1, %v5518_v46  ;;  %v1685_v6 = vsel %vm5218_vm4, %v5113_v52, %v1684_v0  ;;  %v5580_v60 = vsel %vm5218_vm4, %v5127_v62, %v1698_v22  ;;  %v5588_v37 = vrot.slane %v1445_v49, 5  ;;  %v5601_v62 = vsel %vm5218_vm4, %v5156_v36, %v1726_v47  ;;  %v384_v18 = vld [vmem:[%s5310_s7 + $0x44] sm:$0x1] }
  0x52   : > { %v1735_v56 = vor.u32 %v1734_v20, %v1731_v25  ;;  %v6423_v20 = vshrl.u32 %v5120_v57, 16  ;;  %4842 = vmatprep.subr.msk.bf16.mxu0 %vm435_vm0, %v4977_v1  ;;  %v5591_v40 = vcombine.low %v1685_v6, %v5580_v60  ;;  %v5596_v52 = vsel %vm5218_vm4, %v5154_v35, %v1712_v15  ;;  %v346_v25 = vld [vmem:[%s5044_s18 + $0x3c] sm:$0x1] }
  0x53   : > { %v1740_v49 = vrot.slane %v1738_v24, 5  ;;  %v6424_v23 = vshll.u32 %v5120_v57, 16  ;;  %v1752_v63 = vshll.u32 %v342_v38, 16  ;;  %v6425_v29 = vshrl.u32 %v5144_v27, 16  ;;  %v368_v38 = vld [vmem:[%s5310_s7 + $0x4] sm:$0x1] }
  0x54   : > { %v1745_v11 = vrot.slane %v6423_v20, 4  ;;  %v1736_v1 = vrot.slane %v1735_v56, 4  ;;  %v6426_v35 = vshll.u32 %v5144_v27, 16  ;;  %v1766_v15 = vshll.u32 %v344_v26, 16 }
  0x55   : > { %v1748_v31 = vrot.slane %v6424_v23, 5  ;;  %v1759_v0 = vrot.slane %v6425_v29, 4  ;;  %v6427_v56 = vshrl.u32 %v5152_v34, 16  ;;  %v6428_v57 = vshll.u32 %v5152_v34, 16 }
  0x56   : > { %v1762_v22 = vrot.slane %v6426_v35, 5  ;;  %v5614_v36 = vsel %vm5218_vm4, %v1736_v1, %v1740_v49  ;;  %v1754_v20 = vrot.slane %v1752_v63, 5  ;;  %v1768_v1 = vrot.slane %v1766_v15, 5  ;;  %v370_v63 = vld [vmem:[%s5310_s7 + $0xc] sm:$0x1] }
  0x57   : > { %v1749_v47 = vor.u32 %v1748_v31, %v1745_v11  ;;  %v1773_v24 = vrot.slane %v6427_v56, 4  ;;  %v1776_v6 = vrot.slane %v6428_v57, 5  ;;  %4545 = vmatmul.mubr.msk.bf16.vlgmr.msra.gmra.mxu1 %vm422_vm1, %v5161_v39  ;;  %v5625_v27 = vcombine.low %v5601_v62, %v5614_v36 }
  0x58   : > { %v1763_v26 = vor.u32 %v1762_v22, %v1759_v0  ;;  %4563 = vmatpush3.bf16.msra.mxu1 %v4983_v2  ;;  %4548 = vmatprep.mubr.msk.bf16.mxu1 %vm422_vm1, %v5527_v28  ;;  %v1780_v49 = vshll.u32 %v346_v25, 16  ;;  %v2034_v23 = vor.u32 %v5384_v7, %v5382_v19  ;;  %v2037_v29 = vshll.u32 %v368_v38, 16 }
  0x59   : > { %v1750_v11 = vrot.slane %v1749_v47, 4  ;;  %v1777_v34 = vor.u32 %v1776_v6, %v1773_v24  ;;  %4539 = vmatmul.mubr.msk.bf16.gmra.mxu0 %vm422_vm1, %v5530_v5  ;;  %4843 = vmatprep.subr.msk.bf16.mxu1 %vm435_vm0, %v4994_v4  ;;  %v6429_v0 = vshrl.u32 %v5334_v13, 16  ;;  %v6430_v22 = vshll.u32 %v5334_v13, 16  ;;  %v372_v47 = vld [vmem:[%s5310_s7 + $0x14] sm:$0x1] }
  0x5a   : > { %v1764_v31 = vrot.slane %v1763_v26, 4  ;;  %4554 = vmatprep.mubr.msk.bf16.mxu0 %vm422_vm1, %v5550_v44  ;;  %v1782_v25 = vrot.slane %v1780_v49, 5  ;;  %v5647_v4 = vrot.slane %v2034_v23, 4  ;;  %v5656_v57 = vrot.slane %v2037_v29, 5  ;;  %v374_v26 = vld [vmem:[%s5310_s7 + $0x1c] sm:$0x1] }
  0x5b   : > { %v2044_v35 = vrot.slane %v6429_v0, 4  ;;  %v2047_v15 = vrot.slane %v6430_v22, 5  ;;  %v5645_v19 = vsel %vm5218_vm4, %v1750_v11, %v1754_v20  ;;  %v1778_v7 = vrot.slane %v1777_v34, 4 }
  0x5c   : > { %v5654_v24 = vsel %vm5218_vm4, %v1764_v31, %v1768_v1  ;;  %v2051_v20 = vshll.u32 %v370_v63, 16  ;;  %v6431_v11 = vshrl.u32 %v5363_v55, 16  ;;  %v6432_v49 = vshll.u32 %v5363_v55, 16 }
  0x5d   : > { %v2048_v6 = vor.u32 %v2047_v15, %v2044_v35  ;;  %v5660_v38 = vsel %vm5218_vm4, %v1778_v7, %v1782_v25  ;;  %v2065_v29 = vshll.u32 %v372_v47, 16  ;;  %v376_v35 = vld [vmem:[%s5310_s7 + $0x24] sm:$0x1]  ;;  %v6433_v15 = vshrl.u32 %v5366_v33, 16 }
  0x5e   : > { %v2058_v34 = vrot.slane %v6431_v11, 4  ;;  %v2061_v23 = vrot.slane %v6432_v49, 5  ;;  %v2053_v63 = vrot.slane %v2051_v20, 5  ;;  %v6434_v25 = vshll.u32 %v5366_v33, 16  ;;  %v6437_v20 = vld [vmem:[#allocation22_spill] sm:$0xff] }
  0x5f   : > { %v2049_v31 = vrot.slane %v2048_v6, 4  ;;  %v2072_v7 = vrot.slane %v6433_v15, 4  ;;  %4549 = vmatmul.mubr.msk.bf16.gmra.mxu1 %vm422_vm1, %v5544_v8  ;;  %v2067_v49 = vrot.slane %v2065_v29, 5  ;;  %v2079_v0 = vshll.u32 %v374_v26, 16  ;;  %v378_v15 = vld [vmem:[%s5310_s7 + $0x2c] sm:$0x1] }
  0x60   : > { %v2062_v22 = vor.u32 %v2061_v23, %v2058_v34  ;;  %v2075_v11 = vrot.slane %v6434_v25, 5  ;;  %v6435_v1 = vshrl.u32 %v5392_v41, 16  ;;  %v6436_v47 = vshll.u32 %v5392_v41, 16  ;;  %4564 = vmatprep.mubr.msk.bf16.mxu1 %vm422_vm1, %v6437_v20 }
  0x61   : > { %v5688_v34 = vsel %vm5218_vm4, %v2049_v31, %v2053_v63  ;;  %v2093_v25 = vshll.u32 %v376_v35, 16  ;;  %4555 = vmatmul.mubr.msk.bf16.vlgmr.msra.gmra.mxu0 %vm422_vm1, %v6439_v58  ;;  %v1448_v41 = vsel %vm5218_vm4, %v5572_v61, %v5588_v37  ;;  %v2081_v26 = vrot.slane %v2079_v0, 5  ;;  %v380_v31 = vld [vmem:[%s5310_s7 + $0x34] sm:$0x1]  ;;  %v6441_v63 = vld [vmem:[#allocation2_spill] sm:$0xff] }
  0x62   : > { %v2086_v6 = vrot.slane %v6435_v1, 4  ;;  %v2089_v56 = vrot.slane %v6436_v47, 5  ;;  %6438 = vst [vmem:[#allocation22_spill] sm:$0xff] %v5688_v34  ;;  %v2063_v33 = vrot.slane %v2062_v22, 4  ;;  %v2076_v23 = vor.u32 %v2075_v11, %v2072_v7  ;;  %4573 = vmatpush3.bf16.msra.mxu0 %v6441_v63  ;;  %4558 = vmatprep.mubr.msk.bf16.mxu0 %vm422_vm1, %v5565_v43 }
  0x63   : > { %v6440_v29 = vshrl.u32 %v5399_v59, 16  ;;  %v2095_v7 = vrot.slane %v2093_v25, 5  ;;  %v6443_v61 = vshll.u32 %v5399_v59, 16  ;;  %v2107_v11 = vshll.u32 %v378_v15, 16 }
  0x64   : > { %v2090_v1 = vor.u32 %v2089_v56, %v2086_v6  ;;  %v5705_v35 = vsel %vm5218_vm4, %v2063_v33, %v2067_v49  ;;  %v2077_v22 = vrot.slane %v2076_v23, 4  ;;  %v6444_v56 = vld [vmem:[#allocation3_spill] sm:$0xff]  ;;  %v6445_v6 = vshrl.u32 %v5436_v53, 16  ;;  %v382_v23 = vld [vmem:[%s5310_s7 + $0x3c] sm:$0x1] }
  0x65   : > { %v2100_v47 = vrot.slane %v6440_v29, 4  ;;  %6442 = vst [vmem:[#allocation30_spill] sm:$0xff] %v5705_v35  ;;  %v2103_v37 = vrot.slane %v6443_v61, 5  ;;  %4844 = vmatprep.subr.msk.bf16.mxu0 %vm435_vm0, %v6444_v56  ;;  %v6446_v29 = vshll.u32 %v5436_v53, 16  ;;  %v2121_v25 = vshll.u32 %v380_v31, 16  ;;  %v6449_v56 = vld [vmem:[#allocation31_spill] sm:$0xff] }
  0x66   : > { %v2091_v0 = vrot.slane %v2090_v1, 4  ;;  %v2114_v20 = vrot.slane %v6445_v6, 4  ;;  %v5717_v49 = vsel %vm5218_vm4, %v2077_v22, %v2081_v26  ;;  %v6448_v61 = vshrl.u32 %v5451_v21, 16 }
  0x67   : > { %v2117_v5 = vrot.slane %v6446_v29, 5  ;;  %6447 = vst [vmem:[#allocation3_spill] sm:$0xff] %v5717_v49  ;;  %v2104_v33 = vor.u32 %v2103_v37, %v2100_v47  ;;  %v5723_v1 = vcombine.low %v6449_v56, %v1448_v41  ;;  %v2109_v6 = vrot.slane %v2107_v11, 5  ;;  %v383_v47 = vld [vmem:[%s5310_s7 + $0x40] sm:$0xf]  ;;  %v6453_v11 = vld [vmem:[#allocation5_spill] sm:$0xff] }
  0x68   : > { %v2128_v46 = vrot.slane %v6448_v61, 4  ;;  %v5727_v15 = vsel %vm5218_vm4, %v2091_v0, %v2095_v7  ;;  %v2123_v31 = vrot.slane %v2121_v25, 5  ;;  %v6451_v22 = vshll.u32 %v5451_v21, 16  ;;  %v6452_v61 = vld [vmem:[#allocation25_spill] sm:$0xff] }
  0x69   : > { %6450 = vst [vmem:[#allocation31_spill] sm:$0xff] %v5727_v15  ;;  %v2118_v29 = vor.u32 %v2117_v5, %v2114_v20  ;;  %v2105_v63 = vrot.slane %v2104_v33, 4  ;;  %4565 = vmatmul.mubr.msk.bf16.vlgmr.msra.gmra.mxu1 %vm422_vm1, %v6452_v61  ;;  %v2135_v56 = vshll.u32 %v382_v23, 16  ;;  %v3779_v7 = vshrl.u32 %v383_v47, 16  ;;  %v6454_v5 = vld [vmem:[#allocation28_spill] sm:$0xff]  ;;  %4559 = vmatmul.mubr.msk.bf16.gmra.mxu0 %vm422_vm1, %v5723_v1 }
  0x6a   : > { %v2131_v37 = vrot.slane %v6451_v22, 5  ;;  %v3782_v0 = vshll.u32 %v383_v47, 16  ;;  %4583 = vmatpush3.bf16.msra.mxu1 %v6453_v11  ;;  %4568 = vmatprep.mubr.msk.bf16.mxu1 %vm422_vm1, %v6454_v5  ;;  %v3788_v25 = vshll.u32 %v384_v18, 16  ;;  %v5746_v22 = vcombine.low %v5580_v60, %v5596_v52  ;;  %v348_v61 = vld [vmem:[%s5044_s18 + $0x44] sm:$0x1]  ;;  %v6456_v23 = vld [vmem:[#allocation4_spill] sm:$0xff] }
  0x6b   : > { %v2119_v41 = vrot.slane %v2118_v29, 4  ;;  %v5742_v20 = vsel %vm5218_vm4, %v2105_v63, %v2109_v6  ;;  %4845 = vmatprep.subr.msk.bf16.mxu1 %vm435_vm0, %v6456_v23  ;;  %v2137_v5 = vrot.slane %v2135_v56, 5  ;;  %v3781_v63 = vrot.slane %v3779_v7, 4  ;;  %v6458_v6 = vld [vmem:[#allocation11_spill] sm:$0xff] }
  0x6c   : > { %6455 = vst [vmem:[#allocation25_spill] sm:$0xff] %v5742_v20  ;;  %v2132_v33 = vor.u32 %v2131_v37, %v2128_v46  ;;  %4574 = vmatprep.mubr.msk.bf16.mxu0 %vm422_vm1, %v6458_v6  ;;  %v3784_v46 = vrot.slane %v3782_v0, 5  ;;  %v5761_v60 = vcombine.low %v5645_v19, %v5654_v24  ;;  %v3790_v37 = vrot.slane %v3788_v25, 5 }
  0x6d   : > { %v5755_v29 = vsel %vm5218_vm4, %v2119_v41, %v2123_v31  ;;  %v2389_v26 = vor.u32 %v5561_v42, %v5546_v45  ;;  %v2392_v23 = vshll.u32 %v348_v61, 16  ;;  %v5767_v31 = vcombine.low %v5334_v13, %v5363_v55  ;;  %v6461_v42 = vld [vmem:[#allocation33_spill] sm:$0xff]  ;;  %v6466_v61 = vld [vmem:[#allocation15_spill] sm:$0xff] }
  0x6e   : > { %6457 = vst [vmem:[#allocation5_spill] sm:$0xff] %v5755_v29  ;;  %v2133_v18 = vrot.slane %v2132_v33, 4  ;;  %6459 = vst [vmem:[#allocation28_spill] sm:$0xff] %v5761_v60  ;;  %v3785_v56 = vor.u32 %v3784_v46, %v3781_v63  ;;  %v5775_v0 = vcombine.low %v5399_v59, %v5436_v53  ;;  %v5778_v45 = vcombine.low %v5451_v21, %v383_v47  ;;  %v6463_v21 = vld [vmem:[#allocation13_spill] sm:$0xff]  ;;  %v6465_v47 = vld [vmem:[#allocation6_spill] sm:$0xff] }
  0x6f   : > { %v2390_v33 = vrot.slane %v2389_v26, 4  ;;  %v2394_v25 = vrot.slane %v2392_v23, 5  ;;  %v5786_v55 = vcombine.low %v5419_v3, %v5444_v10  ;;  %v5805_v3 = vld [vmem:[%s6296_s4 + $0x14] sm:$0xf]  ;;  %v6467_v10 = vcombine.low %v5596_v52, %v5601_v62  ;;  %v5827_v52 = vld [vmem:[%s6296_s4 + $0x18] sm:$0xf] }
  0x70   : > { %v2138_v41 = vsel %vm5218_vm4, %v2133_v18, %v2137_v5  ;;  %6460 = vst [vmem:[#allocation4_spill] sm:$0xff] %v5775_v0  ;;  %v3786_v6 = vrot.slane %v3785_v56, 4  ;;  %v6469_v5 = vcombine.low %v5614_v36, %v5645_v19  ;;  %v5820_v63 = vcombine.low %v5488_v12, %v5523_v17  ;;  %v6470_v18 = vld [vmem:[#allocation16_spill] sm:$0xff]  ;;  %v6473_v12 = vld [vmem:[#allocation34_spill] sm:$0xff]  ;;  %v5847_v19 = vld [vmem:[%s6296_s4 + $0x1c] sm:$0xf] }
  0x71   : > { %4569 = vmatmul.mubr.msk.bf16.gmra.mxu1 %vm422_vm1, %v6461_v42  ;;  %v2395_v13 = vsel %vm5218_vm4, %v2390_v33, %v2394_v25  ;;  %4575 = vmatmul.mubr.msk.bf16.vlgmr.msra.gmra.mxu0 %vm422_vm1, %v6463_v21  ;;  %v6471_v62 = vld [vmem:[#allocation32_spill] sm:$0xff]  ;;  %v6472_v36 = vcombine.low %v5654_v24, %v5660_v38  ;;  %v6475_v24 = vsel %vm5218_vm4, %v5647_v4, %v5656_v57  ;;  %v6478_v23 = vld [vmem:[#allocation37_spill] sm:$0xff]  ;;  %v6480_v33 = vld [vmem:[#allocation10_spill] sm:$0xff] }
  0x72   : > { %4584 = vmatprep.mubr.msk.bf16.mxu1 %vm422_vm1, %v5591_v40  ;;  %v3791_v59 = vsel %vm5218_vm4, %v3786_v6, %v3790_v37  ;;  %v5793_v53 = vcombine.low %v5660_v38, %v2395_v13  ;;  %4593 = vmatpush3.bf16.msra.mxu0 %v6465_v47  ;;  %v6468_v40 = vld [vmem:[#allocation7_spill] sm:$0xff]  ;;  %v6474_v17 = vld [vmem:[#allocation8_spill] sm:$0xff]  ;;  %v5857_v38 = vcombine.low %v6475_v24, %v5688_v34  ;;  %v6477_v37 = vld [vmem:[#allocation9_spill] sm:$0xff] }
  0x73   : > { %v5797_v26 = vcombine.low %v2138_v41, %v3791_v59  ;;  %4578 = vmatprep.mubr.msk.bf16.mxu0 %vm422_vm1, %v6466_v61  ;;  %4846 = vmatprep.subr.msk.bf16.mxu0 %vm435_vm0, %v5805_v3  ;;  %v6476_v46 = vld [vmem:[#allocation36_spill] sm:$0xff]  ;;  %v5872_v4 = vcombine.low %v5705_v35, %v5717_v49  ;;  %v5876_v57 = vcombine.low %v5727_v15, %v5742_v20  ;;  %v4912_v25 = vld [vmem:[%s6296_s4 + $0x4] sm:$0xf]  ;;  %v5904_v42 = vld [vmem:[%s6296_s4] sm:$0xf] }
  0x74   : > { %6462 = vst [vmem:[#allocation11_spill] sm:$0xff] %v5793_v53  ;;  %v6479_v56 = vld [vmem:[#allocation12_spill] sm:$0xff]  ;;  %v5892_v6 = vcombine.low %v5755_v29, %v2138_v41  ;;  %v5922_v41 = vld [vmem:[%s6296_s4 + $0x8] sm:$0xf]  ;;  %v6481_v13 = vld [vmem:[#allocation2_spill] sm:$0xff] }
  0x75   : > { %6464 = vst [vmem:[#allocation33_spill] sm:$0xff] %v5797_v26  ;;  %v5936_v59 = vld [vmem:[%s6296_s4 + $0xc] sm:$0xf]  ;;  %v5954_v61 = vld [vmem:[%s6296_s4 + $0x10] sm:$0xf]  ;;  %v6487_v24 = vld [vmem:[#allocation17_spill] sm:$0xff] }
  0x76   : > { %v6482_v21 = vld [vmem:[#allocation19_spill] sm:$0xff]  ;;  %v6492_v20 = vld [vmem:[#allocation21_spill] sm:$0xff]  ;;  %v6493_v29 = vld [vmem:[#allocation24_spill] sm:$0xff] }
  0x77   : > { %v6494_v34 = vcombine.low %v6492_v20, %v6493_v29 }
  0x79   : > { %4585 = vmatmul.mubr.msk.bf16.vlgmr.msra.gmra.mxu1 %vm422_vm1, %v6467_v10  ;;  %4579 = vmatmul.mubr.msk.bf16.gmra.mxu0 %vm422_vm1, %v6470_v18  ;;  %v6483_v10 = vld [vmem:[#allocation23_spill] sm:$0xff]  ;;  %v6485_v18 = vld [vmem:[#allocation29_spill] sm:$0xff] }
  0x7a   : > { %4603 = vmatpush3.bf16.msra.mxu1 %v6468_v40  ;;  %4588 = vmatprep.mubr.msk.bf16.mxu1 %vm422_vm1, %v6469_v5  ;;  %v6484_v5 = vld [vmem:[#allocation26_spill] sm:$0xff] }
  0x7b   : > { %4847 = vmatprep.subr.msk.bf16.mxu1 %vm435_vm0, %v5827_v52  ;;  %4594 = vmatprep.mubr.msk.bf16.mxu0 %vm422_vm1, %v6471_v62 }
  0x81   : > { %4589 = vmatmul.mubr.msk.bf16.gmra.mxu1 %vm422_vm1, %v6472_v36  ;;  %4595 = vmatmul.mubr.msk.bf16.vlgmr.msra.gmra.mxu0 %vm422_vm1, %v6473_v12  ;;  %v6486_v36 = vld [vmem:[#allocation39_spill] sm:$0xff] }
  0x82   : > { %4604 = vmatprep.mubr.msk.bf16.mxu1 %vm422_vm1, %v5424_v9  ;;  %4613 = vmatpush3.bf16.msra.mxu0 %v6474_v17 }
  0x83   : > { %4598 = vmatprep.mubr.msk.bf16.mxu0 %vm422_vm1, %v5414_v48  ;;  %4848 = vmatprep.subr.msk.bf16.mxu0 %vm435_vm0, %v5847_v19 }
  0x89   : > { %4605 = vmatmul.mubr.msk.bf16.vlgmr.msra.gmra.mxu1 %vm422_vm1, %v6476_v46  ;;  %4599 = vmatmul.mubr.msk.bf16.gmra.mxu0 %vm422_vm1, %v6478_v23 }
  0x8a   : > { %4623 = vmatpush3.bf16.msra.mxu1 %v6477_v37  ;;  %4608 = vmatprep.mubr.msk.bf16.mxu1 %vm422_vm1, %v5495_v54 }
  0x8b   : > { %4849 = vmatprep.subr.msk.bf16.mxu1 %vm435_vm0, %v6479_v56  ;;  %4614 = vmatprep.mubr.msk.bf16.mxu0 %vm422_vm1, %v5857_v38  ;;  %v6488_v56 = vld [vmem:[#allocation40_spill] sm:$0xff] }
  0x91   : > { %4609 = vmatmul.mubr.msk.bf16.gmra.mxu1 %vm422_vm1, %v5541_v16  ;;  %4615 = vmatmul.mubr.msk.bf16.vlgmr.msra.gmra.mxu0 %vm422_vm1, %v5872_v4 }
  0x92   : > { %4624 = vmatprep.mubr.msk.bf16.mxu1 %vm422_vm1, %v5509_v14  ;;  %4633 = vmatpush3.bf16.msra.mxu0 %v6480_v33 }
  0x93   : > { %4618 = vmatprep.mubr.msk.bf16.mxu0 %vm422_vm1, %v5876_v57  ;;  %4850 = vmatprep.subr.msk.bf16.mxu0 %vm435_vm0, %v4912_v25 }
  0x99   : > { %4625 = vmatmul.mubr.msk.bf16.vlgmr.msra.gmra.mxu1 %vm422_vm1, %v5161_v39  ;;  %4619 = vmatmul.mubr.msk.bf16.gmra.mxu0 %vm422_vm1, %v5892_v6 }
  0x9a   : > { %4643 = vmatpush3.bf16.msra.mxu1 %v5111_v51  ;;  %4628 = vmatprep.mubr.msk.bf16.mxu1 %vm422_vm1, %v5527_v28 }
  0x9b   : > { %4851 = vmatprep.subr.msk.bf16.mxu1 %vm435_vm0, %v5904_v42  ;;  %4634 = vmatprep.mubr.msk.bf16.mxu0 %vm422_vm1, %v5550_v44 }
  0xa1   : > { %4629 = vmatmul.mubr.msk.bf16.gmra.mxu1 %vm422_vm1, %v5544_v8  ;;  %4635 = vmatmul.mubr.msk.bf16.vlgmr.msra.gmra.mxu0 %vm422_vm1, %v6439_v58 }
  0xa2   : > { %4644 = vmatprep.mubr.msk.bf16.mxu1 %vm422_vm1, %v5746_v22  ;;  %4653 = vmatpush3.bf16.msra.mxu0 %v4983_v2 }
  0xa3   : > { %4638 = vmatprep.mubr.msk.bf16.mxu0 %vm422_vm1, %v5565_v43  ;;  %4852 = vmatprep.subr.msk.bf16.mxu0 %vm435_vm0, %v5922_v41 }
  0xa9   : > { %4645 = vmatmul.mubr.msk.bf16.vlgmr.msra.gmra.mxu1 %vm422_vm1, %v5625_v27  ;;  %4639 = vmatmul.mubr.msk.bf16.gmra.mxu0 %vm422_vm1, %v5723_v1 }
  0xaa   : > { %4663 = vmatpush3.bf16.msra.mxu1 %v6481_v13  ;;  %4648 = vmatprep.mubr.msk.bf16.mxu1 %vm422_vm1, %v5761_v60 }
  0xab   : > { %4853 = vmatprep.subr.msk.bf16.mxu1 %vm435_vm0, %v5936_v59  ;;  %4654 = vmatprep.mubr.msk.bf16.mxu0 %vm422_vm1, %v6471_v62 }
  0xb1   : > { %4649 = vmatmul.mubr.msk.bf16.gmra.mxu1 %vm422_vm1, %v5793_v53  ;;  %4655 = vmatmul.mubr.msk.bf16.vlgmr.msra.gmra.mxu0 %vm422_vm1, %v6473_v12 }
  0xb2   : > { %4664 = vmatprep.mubr.msk.bf16.mxu1 %vm422_vm1, %v6482_v21  ;;  %4673 = vmatpush3.bf16.msra.mxu0 %v6453_v11  ;;  %v6489_v21 = vld [vmem:[#allocation41_spill] sm:$0xff] }
  0xb3   : > { %4658 = vmatprep.mubr.msk.bf16.mxu0 %vm422_vm1, %v5414_v48  ;;  %4854 = vmatprep.subr.msk.bf16.mxu0 %vm435_vm0, %v5954_v61 }
  0xb9   : > { %4665 = vmatmul.mubr.msk.bf16.vlgmr.msra.gmra.mxu1 %vm422_vm1, %v6483_v10  ;;  %4659 = vmatmul.mubr.msk.bf16.gmra.mxu0 %vm422_vm1, %v6478_v23  ;;  %v6003_v10 = vld [vmem:[%s6296_s4 + $0x20] sm:$0xf] }
  0xba   : > { %4683 = vmatpush3.bf16.msra.mxu1 %v6465_v47  ;;  %4668 = vmatprep.mubr.msk.bf16.mxu1 %vm422_vm1, %v6484_v5  ;;  %v6490_v5 = vld [vmem:[#allocation20_spill] sm:$0xff] }
  0xbb   : > { %4855 = vmatprep.subr.msk.bf16.mxu1 %vm435_vm0, %v5805_v3  ;;  %4674 = vmatprep.mubr.msk.bf16.mxu0 %vm422_vm1, %v5424_v9 }
  0xc1   : > { %4669 = vmatmul.mubr.msk.bf16.gmra.mxu1 %vm422_vm1, %v6485_v18  ;;  %4675 = vmatmul.mubr.msk.bf16.vlgmr.msra.gmra.mxu0 %vm422_vm1, %v6476_v46  ;;  %v6491_v18 = vld [vmem:[#allocation18_spill] sm:$0xff] }
  0xc2   : > { %4684 = vmatprep.mubr.msk.bf16.mxu1 %vm422_vm1, %v6486_v36  ;;  %4693 = vmatpush3.bf16.msra.mxu0 %v6468_v40  ;;  %v4208_v36 = vcombine.low %v6491_v18, %v6490_v5 }
  0xc3   : > { %4678 = vmatprep.mubr.msk.bf16.mxu0 %vm422_vm1, %v5495_v54  ;;  %4856 = vmatprep.subr.msk.bf16.mxu0 %vm435_vm0, %v5827_v52 }
  0xc9   : > { %4685 = vmatmul.mubr.msk.bf16.vlgmr.msra.gmra.mxu1 %vm422_vm1, %v6487_v24  ;;  %4679 = vmatmul.mubr.msk.bf16.gmra.mxu0 %vm422_vm1, %v5541_v16 }
  0xca   : > { %4703 = vmatpush3.bf16.msra.mxu1 %v6474_v17  ;;  %4688 = vmatprep.mubr.msk.bf16.mxu1 %vm422_vm1, %v6488_v56 }
  0xcb   : > { %4857 = vmatprep.subr.msk.bf16.mxu1 %vm435_vm0, %v5847_v19  ;;  %4694 = vmatprep.mubr.msk.bf16.mxu0 %vm422_vm1, %v5509_v14 }
  0xd1   : > { %4689 = vmatmul.mubr.msk.bf16.gmra.mxu1 %vm422_vm1, %v6489_v21  ;;  %4695 = vmatmul.mubr.msk.bf16.vlgmr.msra.gmra.mxu0 %vm422_vm1, %v5161_v39 }
  0xd2   : > { %4704 = vmatprep.mubr.msk.bf16.mxu1 %vm422_vm1, %v5550_v44  ;;  %4713 = vmatpush3.bf16.msra.mxu0 %v6477_v37 }
  0xd3   : > { %4698 = vmatprep.mubr.msk.bf16.mxu0 %vm422_vm1, %v5527_v28  ;;  %4858 = vmatprep.subr.msk.bf16.mxu0 %vm435_vm0, %v6003_v10 }
  0xd8   : > { %v4476_v24 = vpop.f32.mrf.mxu0 }
  0xd9   : > { %4705 = vmatmul.mubr.msk.bf16.vlgmr.msra.gmra.mxu1 %vm422_vm1, %v6439_v58  ;;  %4699 = vmatmul.mubr.msk.bf16.gmra.mxu0 %vm422_vm1, %v5544_v8 }
  0xda   : > { %4723 = vmatpush3.bf16.msra.mxu1 %v6480_v33  ;;  %4708 = vmatprep.mubr.msk.bf16.mxu1 %vm422_vm1, %v5565_v43  ;;  %v473_v56 = vpop.f32.mrf.mxu0  ;;  %v6497_v33 = vld [vmem:[#allocation35_spill] sm:$0xff] }
  0xdb   : > { %4859 = vmatprep.subr.msk.bf16.mxu1 %vm435_vm0, %v4912_v25  ;;  %4714 = vmatprep.mubr.msk.bf16.mxu0 %vm422_vm1, %v4208_v36  ;;  %v365_v36 = vld [vmem:[%s5170_s28 + $0x40] sm:$0xf] }
  0xdc   : > { %v4486_v21 = vpop.f32.mrf.mxu1  ;;  %v4477_v5 = vpop.f32.mrf.mxu0 }
  0xdd   : > { %v582_v18 = vadd.f32 %v4486_v21, %v4476_v24  ;;  %v6495_v21 = vcombine.low %v5262_v30, %v5292_v50 }
  0xde   : > { %v573_v7 = vpop.f32.mrf.mxu1  ;;  %v476_v15 = vpop.f32.mrf.mxu0 }
  0xdf   : > { %v574_v26 = vadd.f32 %v573_v7, %v473_v56  ;;  %v3099_v7 = vshrl.u32 %v365_v36, 16  ;;  %v3102_v56 = vshll.u32 %v365_v36, 16 }
  0xe0   : > { %v4487_v49 = vpop.f32.mrf.mxu1 }
  0xe1   : > { %4709 = vmatmul.mubr.msk.bf16.gmra.mxu1 %vm422_vm1, %v5723_v1  ;;  %4715 = vmatmul.mubr.msk.bf16.vlgmr.msra.gmra.mxu0 %vm422_vm1, %v6494_v34  ;;  %v585_v25 = vadd.f32 %v4487_v49, %v4477_v5  ;;  %v4480_v53 = vpop.f32.mrf.mxu0  ;;  %v6496_v34 = vld [vmem:[#allocation27_spill] sm:$0xff]  ;;  %v3104_v60 = vrot.slane %v3102_v56, 5 }
  0xe2   : > { %4724 = vmatprep.mubr.msk.bf16.mxu1 %vm422_vm1, %v5767_v31  ;;  %4733 = vmatpush3.bf16.msra.mxu0 %v5111_v51  ;;  %v576_v24 = vpop.f32.mrf.mxu1  ;;  %v4211_v49 = vcombine.low %v6496_v34, %v365_v36  ;;  %v3101_v51 = vrot.slane %v3099_v7, 4 }
  0xe3   : > { %4718 = vmatprep.mubr.msk.bf16.mxu0 %vm422_vm1, %v6495_v21  ;;  %v577_v35 = vadd.f32 %v576_v24, %v476_v15  ;;  %4860 = vmatprep.subr.msk.bf16.mxu0 %vm435_vm0, %v5904_v42  ;;  %v489_v29 = vpop.f32.mrf.mxu0  ;;  %v366_v21 = vld [vmem:[%s5170_s28 + $0x44] sm:$0x1] }
  0xe4   : > { %v4490_v20 = vpop.f32.mrf.mxu1  ;;  %v3105_v24 = vor.u32 %v3104_v60, %v3101_v51  ;;  %v3108_v7 = vshll.u32 %v366_v21, 16 }
  0xe5   : > { %v598_v5 = vadd.f32 %v4490_v20, %v4480_v53  ;;  %v4481_v50 = vpop.f32.mrf.mxu0 }
  0xe6   : > { %v589_v30 = vpop.f32.mrf.mxu1 }
  0xe7   : > { %v590_v15 = vadd.f32 %v589_v30, %v489_v29  ;;  %v492_v36 = vpop.f32.mrf.mxu0 }
  0xe8   : > { %v4491_v42 = vpop.f32.mrf.mxu1 }
  0xe9   : > { %4725 = vmatmul.mubr.msk.bf16.vlgmr.msra.gmra.mxu1 %vm422_vm1, %v6497_v33  ;;  %4719 = vmatmul.mubr.msk.bf16.gmra.mxu0 %vm422_vm1, %v4211_v49  ;;  %v601_v53 = vadd.f32 %v4491_v42, %v4481_v50  ;;  %v3106_v33 = vrot.slane %v3105_v24, 4  ;;  %v6498_v50 = vld [vmem:[#allocation38_spill] sm:$0xff] }
  0xea   : > { %4743 = vmatpush3.bf16.msra.mxu1 %v4983_v2  ;;  %4728 = vmatprep.mubr.msk.bf16.mxu1 %vm422_vm1, %v5775_v0  ;;  %v592_v56 = vpop.f32.mrf.mxu1  ;;  %v3110_v0 = vrot.slane %v3108_v7, 5 }
  0xeb   : > { %4861 = vmatprep.subr.msk.bf16.mxu1 %vm435_vm0, %v5922_v41  ;;  %4734 = vmatprep.mubr.msk.bf16.mxu0 %vm422_vm1, %v5786_v55  ;;  %v593_v20 = vadd.f32 %v592_v56, %v492_v36 }
  0xec   : > { %v4506_v2 = vpop.f32.mrf.mxu1 }
  0xed   : > { %v4496_v34 = vpop.f32.mrf.mxu0 }
  0xee   : > { %v813_v49 = vadd.f32 %v4496_v34, %v582_v18  ;;  %v888_v29 = vpop.f32.mrf.mxu1  ;;  %v3111_v18 = vsel %vm5218_vm4, %v3106_v33, %v3110_v0 }
  0xef   : > { %v780_v41 = vpop.f32.mrf.mxu0 }
  0xf0   : > { %v921_v30 = vadd.f32 %v4506_v2, %v813_v49  ;;  %v811_v51 = vadd.f32 %v780_v41, %v574_v26  ;;  %v4507_v60 = vpop.f32.mrf.mxu1  ;;  %v6499_v2 = vld [vmem:[#allocation42_spill] sm:$0xff] }
  0xf1   : > { %4729 = vmatmul.mubr.msk.bf16.gmra.mxu1 %vm422_vm1, %v5778_v45  ;;  %4735 = vmatmul.mubr.msk.bf16.vlgmr.msra.gmra.mxu0 %vm422_vm1, %v6498_v50  ;;  %v4497_v21 = vpop.f32.mrf.mxu0  ;;  %v6060_v34 = vcombine.low %v6499_v2, %v3111_v18 }
  0xf2   : > { %4744 = vmatprep.mubr.msk.bf16.mxu1 %vm422_vm1, %v5424_v9  ;;  %4753 = vmatpush3.bf16.msra.mxu0 %v6481_v13  ;;  %v919_v42 = vadd.f32 %v888_v29, %v811_v51  ;;  %v814_v36 = vadd.f32 %v4497_v21, %v585_v25  ;;  %v891_v24 = vpop.f32.mrf.mxu1 }
  0xf3   : > { %4738 = vmatprep.mubr.msk.bf16.mxu0 %vm422_vm1, %v5820_v63  ;;  %4862 = vmatprep.subr.msk.bf16.mxu0 %vm435_vm0, %v5936_v59  ;;  %v783_v9 = vpop.f32.mrf.mxu0 }
  0xf4   : > { %v922_v7 = vadd.f32 %v4507_v60, %v814_v36  ;;  %v812_v56 = vadd.f32 %v783_v9, %v577_v35  ;;  %v4510_v26 = vpop.f32.mrf.mxu1 }
  0xf6   : > { %v920_v13 = vadd.f32 %v891_v24, %v812_v56  ;;  %v904_v0 = vpop.f32.mrf.mxu1 }
  0xf8   : > { %v4500_v32 = vpop.f32.mrf.mxu0 }
  0xf9   : > { %4745 = vmatmul.mubr.msk.bf16.vlgmr.msra.gmra.mxu1 %vm422_vm1, %v6476_v46  ;;  %4739 = vmatmul.mubr.msk.bf16.gmra.mxu0 %vm422_vm1, %v6060_v34  ;;  %v817_v35 = vadd.f32 %v4500_v32, %v598_v5 }
  0xfa   : > { %4763 = vmatpush3.bf16.msra.mxu1 %v6453_v11  ;;  %4748 = vmatprep.mubr.msk.bf16.mxu1 %vm422_vm1, %v5495_v54  ;;  %v796_v33 = vpop.f32.mrf.mxu0  ;;  %v4511_v11 = vpop.f32.mrf.mxu1 }
  0xfb   : > { %4863 = vmatprep.subr.msk.bf16.mxu1 %vm435_vm0, %v5954_v61  ;;  %4754 = vmatprep.mubr.msk.bf16.mxu0 %vm422_vm1, %v6471_v62  ;;  %v925_v46 = vadd.f32 %v4510_v26, %v817_v35  ;;  %v815_v59 = vadd.f32 %v796_v33, %v590_v15 }
  0xfc   : > { %v4501_v25 = vpop.f32.mrf.mxu0  ;;  %v907_v61 = vpop.f32.mrf.mxu1 }
  0xfd   : > { %v923_v49 = vadd.f32 %v904_v0, %v815_v59  ;;  %v818_v29 = vadd.f32 %v4501_v25, %v601_v53 }
  0xfe   : > { %v799_v54 = vpop.f32.mrf.mxu0 }
  0xff   : > { %v926_v41 = vadd.f32 %v4511_v11, %v818_v29  ;;  %v816_v51 = vadd.f32 %v799_v54, %v593_v20 }
 0x100   : > { %v4516_v5 = vpop.f32.mrf.mxu0 }
 0x101   : > { %4749 = vmatmul.mubr.msk.bf16.gmra.mxu1 %vm422_vm1, %v5541_v16  ;;  %4755 = vmatmul.mubr.msk.bf16.vlgmr.msra.gmra.mxu0 %vm422_vm1, %v6473_v12  ;;  %v924_v62 = vadd.f32 %v907_v61, %v816_v51  ;;  %v1029_v15 = vadd.f32 %v4516_v5, %v921_v30 }
 0x102   : > { %4764 = vmatprep.mubr.msk.bf16.mxu1 %vm422_vm1, %v5857_v38  ;;  %4773 = vmatpush3.bf16.msra.mxu0 %v6465_v47  ;;  %v996_v53 = vpop.f32.mrf.mxu0 }
 0x103   : > { %4758 = vmatprep.mubr.msk.bf16.mxu0 %vm422_vm1, %v5414_v48  ;;  %4864 = vmatprep.subr.msk.bf16.mxu0 %vm435_vm0, %v5805_v3  ;;  %v1027_v16 = vadd.f32 %v996_v53, %v919_v42 }
 0x104   : > { %v4526_v20 = vpop.f32.mrf.mxu1  ;;  %v4517_v60 = vpop.f32.mrf.mxu0 }
 0x105   : > { %v1241_v38 = vadd.f32 %v4526_v20, %v1029_v15  ;;  %v1030_v21 = vadd.f32 %v4517_v60, %v922_v7 }
 0x106   : > { %v1208_v12 = vpop.f32.mrf.mxu1  ;;  %v999_v18 = vpop.f32.mrf.mxu0 }
 0x107   : > { %v1239_v30 = vadd.f32 %v1208_v12, %v1027_v16  ;;  %v1028_v47 = vadd.f32 %v999_v18, %v920_v13 }
 0x108   : > { %v4527_v48 = vpop.f32.mrf.mxu1  ;;  %v4520_v36 = vpop.f32.mrf.mxu0 }
 0x109   : > { %4765 = vmatmul.mubr.msk.bf16.vlgmr.msra.gmra.mxu1 %vm422_vm1, %v5872_v4  ;;  %4759 = vmatmul.mubr.msk.bf16.gmra.mxu0 %vm422_vm1, %v6478_v23  ;;  %v1242_v3 = vadd.f32 %v4527_v48, %v1030_v21  ;;  %v1033_v42 = vadd.f32 %v4520_v36, %v925_v46  ;;  %v6501_v21 = vld [vmem:[#allocation28_spill] sm:$0xff] }
 0x10a   : > { %4783 = vmatpush3.bf16.msra.mxu1 %v6468_v40  ;;  %4768 = vmatprep.mubr.msk.bf16.mxu1 %vm422_vm1, %v5876_v57  ;;  %v1211_v4 = vpop.f32.mrf.mxu1  ;;  %v1012_v24 = vpop.f32.mrf.mxu0 }
 0x10b   : > { %4865 = vmatprep.subr.msk.bf16.mxu1 %vm435_vm0, %v5827_v52  ;;  %4774 = vmatprep.mubr.msk.bf16.mxu0 %vm422_vm1, %v5509_v14  ;;  %v1240_v40 = vadd.f32 %v1211_v4, %v1028_v47  ;;  %v1031_v9 = vadd.f32 %v1012_v24, %v923_v49  ;;  %v6503_v4 = vld [vmem:[#allocation14_spill] sm:$0xff] }
 0x10c   : > { %v4521_v7 = vpop.f32.mrf.mxu0 }
 0x10d   : > { %v1034_v56 = vadd.f32 %v4521_v7, %v926_v41 }
 0x10e   : > { %v1015_v26 = vpop.f32.mrf.mxu0 }
 0x10f   : > { %v4530_v57 = vpop.f32.mrf.mxu1  ;;  %v1032_v2 = vadd.f32 %v1015_v26, %v924_v62 }
 0x110   : > { %v1245_v23 = vadd.f32 %v4530_v57, %v1033_v42  ;;  %v4536_v13 = vpop.f32.mrf.mxu0 }
 0x111   : > { %4769 = vmatmul.mubr.msk.bf16.gmra.mxu1 %vm422_vm1, %v5892_v6  ;;  %v1224_v52 = vpop.f32.mrf.mxu1  ;;  %4775 = vmatmul.mubr.msk.bf16.vlgmr.msra.gmra.mxu0 %vm422_vm1, %v5161_v39  ;;  %v1335_v32 = vadd.f32 %v4536_v13, %v1241_v38  ;;  %v6500_v38 = vld [vmem:[#allocation10_spill] sm:$0xff] }
 0x112   : > { %4784 = vmatprep.mubr.msk.bf16.mxu1 %vm422_vm1, %v5550_v44  ;;  %v1243_v14 = vadd.f32 %v1224_v52, %v1031_v9  ;;  %4793 = vmatpush3.bf16.msra.mxu0 %v6474_v17  ;;  %v1302_v6 = vpop.f32.mrf.mxu0  ;;  %v6506_v52 = vld [vmem:[#allocation30_spill] sm:$0xff] }
 0x113   : > { %4778 = vmatprep.mubr.msk.bf16.mxu0 %vm422_vm1, %v5527_v28  ;;  %v4531_v0 = vpop.f32.mrf.mxu1  ;;  %4866 = vmatprep.subr.msk.bf16.mxu0 %vm435_vm0, %v5847_v19  ;;  %v1333_v33 = vadd.f32 %v1302_v6, %v1239_v30  ;;  %v6507_v13 = vld [vmem:[#allocation22_spill] sm:$0xff] }
 0x114   : > { %v1246_v35 = vadd.f32 %v4531_v0, %v1034_v56  ;;  %v4537_v46 = vpop.f32.mrf.mxu0  ;;  %v6505_v56 = vld [vmem:[#allocation11_spill] sm:$0xff] }
 0x115   : > { %v1227_v44 = vpop.f32.mrf.mxu1  ;;  %v1336_v25 = vadd.f32 %v4537_v46, %v1242_v3 }
 0x116   : > { %v1244_v59 = vadd.f32 %v1227_v44, %v1032_v2  ;;  %v1305_v39 = vpop.f32.mrf.mxu0 }
 0x117   : > { %v4546_v11 = vpop.f32.mrf.mxu1  ;;  %v1334_v28 = vadd.f32 %v1305_v39, %v1240_v40  ;;  %v6504_v40 = vld [vmem:[#allocation4_spill] sm:$0xff] }
 0x118   : > { %v1429_v17 = vadd.f32 %v4546_v11, %v1335_v32 }
 0x119   : > { %4785 = vmatmul.mubr.msk.bf16.vlgmr.msra.gmra.mxu1 %vm422_vm1, %v6439_v58  ;;  %v1396_v49 = vpop.f32.mrf.mxu1  ;;  %v4540_v19 = vpop.f32.mrf.mxu0  ;;  %4779 = vmatmul.mubr.msk.bf16.gmra.mxu0 %vm422_vm1, %v5544_v8 }
 0x11a   : > { %4803 = vmatpush3.bf16.msra.mxu1 %v6477_v37  ;;  %4788 = vmatprep.mubr.msk.bf16.mxu1 %vm422_vm1, %v5565_v43  ;;  %v1427_v29 = vadd.f32 %v1396_v49, %v1333_v33  ;;  %v1339_v54 = vadd.f32 %v4540_v19, %v1245_v23 }
 0x11b   : > { %4867 = vmatprep.subr.msk.bf16.mxu1 %vm435_vm0, %v6003_v10  ;;  %4794 = vmatprep.mubr.msk.bf16.mxu0 %vm422_vm1, %v5746_v22  ;;  %v4547_v58 = vpop.f32.mrf.mxu1  ;;  %v1318_v41 = vpop.f32.mrf.mxu0 }
 0x11c   : > { %v1430_v37 = vadd.f32 %v4547_v58, %v1336_v25  ;;  %v1337_v51 = vadd.f32 %v1318_v41, %v1243_v14  ;;  %v4264_v14 = vcombine.low %v6507_v13, %v6506_v52  ;;  %v6510_v58 = vld [vmem:[#allocation3_spill] sm:$0xff] }
 0x11d   : > { %v1399_v61 = vpop.f32.mrf.mxu1  ;;  %v4541_v5 = vpop.f32.mrf.mxu0  ;;  %v6511_v41 = vld [vmem:[#allocation31_spill] sm:$0xff] }
 0x11e   : > { %v1428_v43 = vadd.f32 %v1399_v61, %v1334_v28  ;;  %v1340_v62 = vadd.f32 %v4541_v5, %v1246_v35  ;;  %v6509_v28 = vld [vmem:[#allocation25_spill] sm:$0xff] }
 0x11f   : > { %v4550_v15 = vpop.f32.mrf.mxu1  ;;  %v1321_v8 = vpop.f32.mrf.mxu0 }
 0x120   : > { %v1433_v53 = vadd.f32 %v4550_v15, %v1339_v54  ;;  %v1338_v10 = vadd.f32 %v1321_v8, %v1244_v59 }
 0x121   : > { %4789 = vmatmul.mubr.msk.bf16.gmra.mxu1 %vm422_vm1, %v5723_v1  ;;  %v1412_v16 = vpop.f32.mrf.mxu1  ;;  %v4556_v22 = vpop.f32.mrf.mxu0  ;;  %4795 = vmatmul.mubr.msk.bf16.vlgmr.msra.gmra.mxu0 %vm422_vm1, %v5625_v27  ;;  %v6502_v27 = vld [vmem:[#allocation35_spill] sm:$0xff] }
 0x122   : > { %4804 = vmatprep.mubr.msk.bf16.mxu1 %vm422_vm1, %v5767_v31  ;;  %v1431_v20 = vadd.f32 %v1412_v16, %v1337_v51  ;;  %v6123_v60 = vadd.f32 %v4556_v22, %v1429_v17  ;;  %4813 = vmatpush3.bf16.msra.mxu0 %v6500_v38  ;;  %v6508_v17 = vld [vmem:[#allocation5_spill] sm:$0xff] }
 0x123   : > { %4798 = vmatprep.mubr.msk.bf16.mxu0 %vm422_vm1, %v6501_v21  ;;  %v4551_v1 = vpop.f32.mrf.mxu1  ;;  %v1503_v12 = vpop.f32.mrf.mxu0 }
 0x124   : > { %v1434_v18 = vadd.f32 %v4551_v1, %v1340_v62  ;;  %v6128_v30 = vadd.f32 %v1503_v12, %v1427_v29  ;;  %v6513_v1 = vld [vmem:[#allocation33_spill] sm:$0xff] }
 0x125   : > { %v1415_v47 = vpop.f32.mrf.mxu1  ;;  %v4557_v31 = vpop.f32.mrf.mxu0 }
 0x126   : > { %v1432_v48 = vadd.f32 %v1415_v47, %v1338_v10  ;;  %v6130_v36 = vadd.f32 %v4557_v31, %v1430_v37  ;;  %v6512_v37 = vcombine.low %v6510_v58, %v6511_v41 }
 0x127   : > { %v1506_v42 = vpop.f32.mrf.mxu0 }
 0x128   : > { %v6135_v24 = vadd.f32 %v1506_v42, %v1428_v43 }
 0x129   : > { %v4566_v3 = vpop.f32.mrf.mxu1  ;;  %4805 = vmatmul.mubr.msk.bf16.vlgmr.msra.gmra.mxu1 %vm422_vm1, %v6502_v27  ;;  %v4560_v7 = vpop.f32.mrf.mxu0  ;;  %4799 = vmatmul.mubr.msk.bf16.gmra.mxu0 %vm422_vm1, %v6505_v56 }
 0x12a   : > { %4823 = vmatpush3.bf16.msra.mxu1 %v6503_v4  ;;  %4808 = vmatprep.mubr.msk.bf16.mxu1 %vm422_vm1, %v6504_v40  ;;  %v6141_v57 = vadd.f32 %v4560_v7, %v1433_v53 }
 0x12b   : > { %v1576_v9 = vpop.f32.mrf.mxu1  ;;  %4814 = vmatprep.mubr.msk.bf16.mxu0 %vm422_vm1, %v5786_v55  ;;  %v1519_v23 = vpop.f32.mrf.mxu0 }
 0x12c   : > { %v6145_v2 = vadd.f32 %v1519_v23, %v1431_v20 }
 0x12d   : > { %v4567_v26 = vpop.f32.mrf.mxu1  ;;  %v4561_v0 = vpop.f32.mrf.mxu0 }
 0x12e   : > { %v6149_v6 = vadd.f32 %v4561_v0, %v1434_v18 }
 0x12f   : > { %v1579_v32 = vpop.f32.mrf.mxu1  ;;  %v1522_v33 = vpop.f32.mrf.mxu0 }
 0x130   : > { %v6153_v44 = vadd.f32 %v1522_v33, %v1432_v48 }
 0x131   : > { %v4570_v35 = vpop.f32.mrf.mxu1  ;;  %4809 = vmatmul.mubr.msk.bf16.gmra.mxu1 %vm422_vm1, %v5778_v45  ;;  %v4576_v46 = vpop.f32.mrf.mxu0  ;;  %4815 = vmatmul.mubr.msk.bf16.vlgmr.msra.gmra.mxu0 %vm422_vm1, %v6498_v50  ;;  %v4266_v45 = vcombine.low %v6509_v28, %v6508_v17 }
 0x132   : > { %4824 = vmatprep.mubr.msk.bf16.mxu1 %vm422_vm1, %v4264_v14  ;;  %v1650_v59 = vadd.f32 %v4576_v46, %v4566_v3  ;;  %4818 = vmatprep.mubr.msk.bf16.mxu0 %vm422_vm1, %v5820_v63 }
 0x133   : > { %v1592_v55 = vpop.f32.mrf.mxu1  ;;  %v1641_v11 = vpop.f32.mrf.mxu0 }
 0x134   : > { %v1642_v39 = vadd.f32 %v1641_v11, %v1576_v9 }
 0x135   : > { %v4571_v25 = vpop.f32.mrf.mxu1  ;;  %v4577_v19 = vpop.f32.mrf.mxu0 }
 0x136   : > { %v1653_v29 = vadd.f32 %v4577_v19, %v4567_v26 }
 0x137   : > { %v1595_v49 = vpop.f32.mrf.mxu1  ;;  %v1644_v50 = vpop.f32.mrf.mxu0 }
 0x138   : > { %v1645_v61 = vadd.f32 %v1644_v50, %v1579_v32 }
 0x139   : > { %v4586_v54 = vpop.f32.mrf.mxu1  ;;  %4825 = vmatmul.mubr.msk.bf16.vlgmr.msra.gmra.mxu1 %vm422_vm1, %v6512_v37  ;;  %v4580_v5 = vpop.f32.mrf.mxu0  ;;  %4819 = vmatmul.mubr.msk.bf16.gmra.mxu0 %vm422_vm1, %v6060_v34 }
 0x13a   : > { %v1875_v51 = vadd.f32 %v4586_v54, %v1650_v59  ;;  %4828 = vmatprep.mubr.msk.bf16.mxu1 %vm422_vm1, %v4266_v45  ;;  %v1666_v62 = vadd.f32 %v4580_v5, %v4570_v35 }
 0x13b   : > { %v1842_v63 = vpop.f32.mrf.mxu1  ;;  %v1657_v8 = vpop.f32.mrf.mxu0 }
 0x13c   : > { %v1873_v43 = vadd.f32 %v1842_v63, %v1642_v39  ;;  %v1658_v10 = vadd.f32 %v1657_v8, %v1592_v55 }
 0x13d   : > { %v4587_v15 = vpop.f32.mrf.mxu1  ;;  %v4581_v22 = vpop.f32.mrf.mxu0 }
 0x13e   : > { %v1876_v53 = vadd.f32 %v4587_v15, %v1653_v29  ;;  %v1669_v38 = vadd.f32 %v4581_v22, %v4571_v25 }
 0x13f   : > { %v1845_v16 = vpop.f32.mrf.mxu1  ;;  %v1660_v12 = vpop.f32.mrf.mxu0 }
 0x140   : > { %v1874_v20 = vadd.f32 %v1845_v16, %v1645_v61  ;;  %v1661_v47 = vadd.f32 %v1660_v12, %v1595_v49 }
 0x141   : > { %v4590_v21 = vpop.f32.mrf.mxu1  ;;  %4829 = vmatmul.mubr.msk.bf16.gmra.mxu1 %vm422_vm1, %v6513_v1  ;;  %v4596_v48 = vpop.f32.mrf.mxu0 }
 0x142   : > { %v1879_v18 = vadd.f32 %v4590_v21, %v1666_v62  ;;  %v1948_v3 = vadd.f32 %v4596_v48, %v1875_v51 }
 0x143   : > { %v1858_v31 = vpop.f32.mrf.mxu1  ;;  %v1915_v42 = vpop.f32.mrf.mxu0 }
 0x144   : > { %v1877_v34 = vadd.f32 %v1858_v31, %v1658_v10  ;;  %v1946_v40 = vadd.f32 %v1915_v42, %v1873_v43 }
 0x145   : > { %v4591_v27 = vpop.f32.mrf.mxu1  ;;  %v4597_v7 = vpop.f32.mrf.mxu0 }
 0x146   : > { %v1880_v4 = vadd.f32 %v4591_v27, %v1669_v38  ;;  %v1949_v26 = vadd.f32 %v4597_v7, %v1876_v53 }
 0x147   : > { %v1861_v9 = vpop.f32.mrf.mxu1  ;;  %v1918_v52 = vpop.f32.mrf.mxu0 }
 0x148   : > { %v1878_v56 = vadd.f32 %v1861_v9, %v1661_v47  ;;  %v1947_v14 = vadd.f32 %v1918_v52, %v1874_v20 }
 0x149   : > { %v4606_v23 = vpop.f32.mrf.mxu1  ;;  %v4600_v0 = vpop.f32.mrf.mxu0 }
 0x14a   : > { %v2021_v13 = vadd.f32 %v4606_v23, %v1948_v3  ;;  %v1952_v33 = vadd.f32 %v4600_v0, %v1879_v18 }
 0x14b   : > { %v1988_v32 = vpop.f32.mrf.mxu1  ;;  %v1931_v46 = vpop.f32.mrf.mxu0 }
 0x14c   : > { %v2019_v35 = vadd.f32 %v1988_v32, %v1946_v40  ;;  %v1950_v25 = vadd.f32 %v1931_v46, %v1877_v34 }
 0x14d   : > { %v4607_v55 = vpop.f32.mrf.mxu1  ;;  %v4601_v39 = vpop.f32.mrf.mxu0 }
 0x14e   : > { %v2022_v59 = vadd.f32 %v4607_v55, %v1949_v26  ;;  %v1953_v28 = vadd.f32 %v4601_v39, %v1880_v4 }
 0x14f   : > { %v1991_v11 = vpop.f32.mrf.mxu1  ;;  %v1934_v49 = vpop.f32.mrf.mxu0 }
 0x150   : > { %v2020_v17 = vadd.f32 %v1991_v11, %v1947_v14  ;;  %v1951_v29 = vadd.f32 %v1934_v49, %v1878_v56 }
 0x151   : > { %v4610_v45 = vpop.f32.mrf.mxu1  ;;  %v4616_v58 = vpop.f32.mrf.mxu0 }
 0x152   : > { %v2025_v19 = vadd.f32 %v4610_v45, %v1952_v33  ;;  %v2230_v37 = vadd.f32 %v4616_v58, %v2021_v13 }
 0x153   : > { %v2004_v54 = vpop.f32.mrf.mxu1  ;;  %v2197_v51 = vpop.f32.mrf.mxu0 }
 0x154   : > { %v2023_v41 = vadd.f32 %v2004_v54, %v1950_v25  ;;  %v2228_v63 = vadd.f32 %v2197_v51, %v2019_v35 }
 0x155   : > { %v4611_v50 = vpop.f32.mrf.mxu1  ;;  %v4617_v43 = vpop.f32.mrf.mxu0 }
 0x156   : > { %v2026_v61 = vadd.f32 %v4611_v50, %v1953_v28  ;;  %v2231_v15 = vadd.f32 %v4617_v43, %v2022_v59 }
 0x157   : > { %v2007_v5 = vpop.f32.mrf.mxu1  ;;  %v2200_v53 = vpop.f32.mrf.mxu0 }
 0x158   : > { %v2024_v62 = vadd.f32 %v2007_v5, %v1951_v29  ;;  %v2229_v16 = vadd.f32 %v2200_v53, %v2020_v17 }
 0x159   : > { %v4626_v8 = vpop.f32.mrf.mxu1  ;;  %v4620_v20 = vpop.f32.mrf.mxu0 }
 0x15a   : > { %v2303_v10 = vadd.f32 %v4626_v8, %v2230_v37  ;;  %v2234_v21 = vadd.f32 %v4620_v20, %v2025_v19 }
 0x15b   : > { %v2270_v22 = vpop.f32.mrf.mxu1  ;;  %v2213_v12 = vpop.f32.mrf.mxu0 }
 0x15c   : > { %v2301_v38 = vadd.f32 %v2270_v22, %v2228_v63  ;;  %v2232_v47 = vadd.f32 %v2213_v12, %v2023_v41 }
 0x15d   : > { %v4627_v1 = vpop.f32.mrf.mxu1  ;;  %v4621_v48 = vpop.f32.mrf.mxu0 }
 0x15e   : > { %v2304_v18 = vadd.f32 %v4627_v1, %v2231_v15  ;;  %v2235_v3 = vadd.f32 %v4621_v48, %v2026_v61 }
 0x15f   : > { %v2273_v31 = vpop.f32.mrf.mxu1  ;;  %v2216_v42 = vpop.f32.mrf.mxu0 }
 0x160   : > { %v2302_v34 = vadd.f32 %v2273_v31, %v2229_v16  ;;  %v2233_v40 = vadd.f32 %v2216_v42, %v2024_v62 }
 0x161   : > { %v4630_v27 = vpop.f32.mrf.mxu1  ;;  %v4636_v7 = vpop.f32.mrf.mxu0 }
 0x162   : > { %v2307_v4 = vadd.f32 %v4630_v27, %v2234_v21  ;;  %v2376_v26 = vadd.f32 %v4636_v7, %v2303_v10 }
 0x163   : > { %v2286_v9 = vpop.f32.mrf.mxu1  ;;  %v2343_v52 = vpop.f32.mrf.mxu0 }
 0x164   : > { %v2305_v56 = vadd.f32 %v2286_v9, %v2232_v47  ;;  %v2374_v14 = vadd.f32 %v2343_v52, %v2301_v38 }
 0x165   : > { %v4631_v23 = vpop.f32.mrf.mxu1  ;;  %v4637_v0 = vpop.f32.mrf.mxu0 }
 0x166   : > { %v2308_v13 = vadd.f32 %v4631_v23, %v2235_v3  ;;  %v2377_v33 = vadd.f32 %v4637_v0, %v2304_v18 }
 0x167   : > { %v2289_v32 = vpop.f32.mrf.mxu1  ;;  %v2346_v46 = vpop.f32.mrf.mxu0 }
 0x168   : > { %v2306_v35 = vadd.f32 %v2289_v32, %v2233_v40  ;;  %v2375_v25 = vadd.f32 %v2346_v46, %v2302_v34 }
 0x169   : > { %v4646_v55 = vpop.f32.mrf.mxu1  ;;  %v4640_v39 = vpop.f32.mrf.mxu0 }
 0x16a   : > { %v6171_v59 = vadd.f32 %v4646_v55, %v2376_v26  ;;  %v2380_v45 = vadd.f32 %v4640_v39, %v2307_v4 }
 0x16b   : > { %v2447_v11 = vpop.f32.mrf.mxu1  ;;  %v2359_v19 = vpop.f32.mrf.mxu0 }
 0x16c   : > { %v2488_v17 = vmax.f32 %v6123_v60, %v6171_v59  ;;  %v6175_v28 = vadd.f32 %v2447_v11, %v2374_v14  ;;  %v2378_v58 = vadd.f32 %v2359_v19, %v2305_v56 }
 0x16d   : > { %v4647_v49 = vpop.f32.mrf.mxu1  ;;  %v4641_v37 = vpop.f32.mrf.mxu0 }
 0x16e   : > { %v2486_v29 = vmax.f32 %v6128_v30, %v6175_v28  ;;  %v6179_v54 = vadd.f32 %v4647_v49, %v2377_v33  ;;  %v2381_v61 = vadd.f32 %v4641_v37, %v2308_v13 }
 0x16f   : > { %v2450_v41 = vpop.f32.mrf.mxu1  ;;  %v2362_v5 = vpop.f32.mrf.mxu0 }
 0x170   : > { %v2489_v50 = vmax.f32 %v6130_v36, %v6179_v54  ;;  %v6183_v51 = vadd.f32 %v2450_v41, %v2375_v25  ;;  %v2379_v15 = vadd.f32 %v2362_v5, %v2306_v35 }
 0x171   : > { %v4650_v63 = vpop.f32.mrf.mxu1  ;;  %v4656_v53 = vpop.f32.mrf.mxu0 }
 0x172   : > { %v2487_v43 = vmax.f32 %v6135_v24, %v6183_v51  ;;  %v6187_v62 = vadd.f32 %v4650_v63, %v2380_v45 }
 0x173   : > { %v2463_v8 = vpop.f32.mrf.mxu1  ;;  %v2528_v20 = vpop.f32.mrf.mxu0 }
 0x174   : > { %v2492_v10 = vmax.f32 %v6141_v57, %v6187_v62  ;;  %v6191_v16 = vadd.f32 %v2463_v8, %v2378_v58 }
 0x175   : > { %v4651_v22 = vpop.f32.mrf.mxu1  ;;  %v4657_v12 = vpop.f32.mrf.mxu0 }
 0x176   : > { %v2490_v38 = vmax.f32 %v6145_v2, %v6191_v16  ;;  %v6195_v21 = vadd.f32 %v4651_v22, %v2381_v61 }
 0x177   : > { %v2466_v1 = vpop.f32.mrf.mxu1  ;;  %v2531_v48 = vpop.f32.mrf.mxu0 }
 0x178   : > { %v2493_v18 = vmax.f32 %v6149_v6, %v6195_v21  ;;  %v6199_v47 = vadd.f32 %v2466_v1, %v2379_v15 }
 0x179   : > { %v4666_v31 = vpop.f32.mrf.mxu1  ;;  %v4660_v42 = vpop.f32.mrf.mxu0 }
 0x17a   : > { %v2491_v34 = vmax.f32 %v6153_v44, %v6199_v47  ;;  %v2602_v3 = vadd.f32 %v4666_v31, %v4656_v53 }
 0x17b   : > { %v2593_v27 = vpop.f32.mrf.mxu1  ;;  %v2544_v9 = vpop.f32.mrf.mxu0 }
 0x17c   : > { %v2594_v4 = vadd.f32 %v2593_v27, %v2528_v20 }
 0x17d   : > { %v4667_v40 = vpop.f32.mrf.mxu1  ;;  %v4661_v26 = vpop.f32.mrf.mxu0 }
 0x17e   : > { %v2605_v7 = vadd.f32 %v4667_v40, %v4657_v12 }
 0x17f   : > { %v2596_v56 = vpop.f32.mrf.mxu1  ;;  %v2547_v13 = vpop.f32.mrf.mxu0 }
 0x180   : > { %v2597_v23 = vadd.f32 %v2596_v56, %v2531_v48 }
 0x181   : > { %v4670_v52 = vpop.f32.mrf.mxu1  ;;  %v4676_v0 = vpop.f32.mrf.mxu0 }
 0x182   : > { %v2618_v14 = vadd.f32 %v4670_v52, %v4660_v42  ;;  %v2691_v33 = vadd.f32 %v4676_v0, %v2602_v3 }
 0x183   : > { %v2609_v32 = vpop.f32.mrf.mxu1  ;;  %v2658_v46 = vpop.f32.mrf.mxu0 }
 0x184   : > { %v2610_v35 = vadd.f32 %v2609_v32, %v2544_v9  ;;  %v2689_v11 = vadd.f32 %v2658_v46, %v2594_v4 }
 0x185   : > { %v4671_v55 = vpop.f32.mrf.mxu1  ;;  %v4677_v45 = vpop.f32.mrf.mxu0 }
 0x186   : > { %v2621_v25 = vadd.f32 %v4671_v55, %v4661_v26  ;;  %v2692_v19 = vadd.f32 %v4677_v45, %v2605_v7 }
 0x187   : > { %v2612_v39 = vpop.f32.mrf.mxu1  ;;  %v2661_v41 = vpop.f32.mrf.mxu0 }
 0x188   : > { %v2613_v49 = vadd.f32 %v2612_v39, %v2547_v13  ;;  %v2690_v61 = vadd.f32 %v2661_v41, %v2597_v23 }
 0x189   : > { %v4686_v58 = vpop.f32.mrf.mxu1  ;;  %v4680_v5 = vpop.f32.mrf.mxu0 }
 0x18a   : > { %v2764_v37 = vadd.f32 %v4686_v58, %v2691_v33  ;;  %v2695_v8 = vadd.f32 %v4680_v5, %v2618_v14 }
 0x18b   : > { %v2731_v63 = vpop.f32.mrf.mxu1  ;;  %v2674_v22 = vpop.f32.mrf.mxu0 }
 0x18c   : > { %v2762_v15 = vadd.f32 %v2731_v63, %v2689_v11  ;;  %v2693_v1 = vadd.f32 %v2674_v22, %v2610_v35 }
 0x18d   : > { %v4687_v53 = vpop.f32.mrf.mxu1  ;;  %v4681_v31 = vpop.f32.mrf.mxu0 }
 0x18e   : > { %v2765_v20 = vadd.f32 %v4687_v53, %v2692_v19  ;;  %v2696_v3 = vadd.f32 %v4681_v31, %v2621_v25 }
 0x18f   : > { %v2734_v12 = vpop.f32.mrf.mxu1  ;;  %v2677_v42 = vpop.f32.mrf.mxu0 }
 0x190   : > { %v2763_v48 = vadd.f32 %v2734_v12, %v2690_v61  ;;  %v2694_v40 = vadd.f32 %v2677_v42, %v2613_v49 }
 0x191   : > { %v4690_v27 = vpop.f32.mrf.mxu1  ;;  %v4696_v7 = vpop.f32.mrf.mxu0 }
 0x192   : > { %v2768_v4 = vadd.f32 %v4690_v27, %v2695_v8  ;;  %v2837_v26 = vadd.f32 %v4696_v7, %v2764_v37 }
 0x193   : > { %v2747_v9 = vpop.f32.mrf.mxu1  ;;  %v2804_v52 = vpop.f32.mrf.mxu0 }
 0x194   : > { %v2766_v56 = vadd.f32 %v2747_v9, %v2693_v1  ;;  %v2835_v14 = vadd.f32 %v2804_v52, %v2762_v15 }
 0x195   : > { %v4691_v23 = vpop.f32.mrf.mxu1  ;;  %v4697_v0 = vpop.f32.mrf.mxu0 }
 0x196   : > { %v2769_v13 = vadd.f32 %v4691_v23, %v2696_v3  ;;  %v2838_v35 = vadd.f32 %v4697_v0, %v2765_v20 }
 0x197   : > { %v2750_v32 = vpop.f32.mrf.mxu1  ;;  %v2807_v46 = vpop.f32.mrf.mxu0 }
 0x198   : > { %v2767_v33 = vadd.f32 %v2750_v32, %v2694_v40  ;;  %v2836_v25 = vadd.f32 %v2807_v46, %v2763_v48 }
 0x199   : > { %v4706_v55 = vpop.f32.mrf.mxu1  ;;  %v4700_v45 = vpop.f32.mrf.mxu0 }
 0x19a   : > { %v2910_v11 = vadd.f32 %v4706_v55, %v2837_v26  ;;  %v2841_v49 = vadd.f32 %v4700_v45, %v2768_v4 }
 0x19b   : > { %v2877_v39 = vpop.f32.mrf.mxu1  ;;  %v2820_v41 = vpop.f32.mrf.mxu0 }
 0x19c   : > { %v2908_v19 = vadd.f32 %v2877_v39, %v2835_v14  ;;  %v2839_v37 = vadd.f32 %v2820_v41, %v2766_v56 }
 0x19d   : > { %v4707_v58 = vpop.f32.mrf.mxu1  ;;  %v4701_v5 = vpop.f32.mrf.mxu0 }
 0x19e   : > { %v2911_v61 = vadd.f32 %v4707_v58, %v2838_v35  ;;  %v2842_v15 = vadd.f32 %v4701_v5, %v2769_v13 }
 0x19f   : > { %v2880_v63 = vpop.f32.mrf.mxu1  ;;  %v2823_v22 = vpop.f32.mrf.mxu0 }
 0x1a0   : > { %v2909_v8 = vadd.f32 %v2880_v63, %v2836_v25  ;;  %v2840_v20 = vadd.f32 %v2823_v22, %v2767_v33 }
 0x1a1   : > { %v4710_v53 = vpop.f32.mrf.mxu1  ;;  %v4716_v31 = vpop.f32.mrf.mxu0 }
 0x1a2   : > { %v2914_v1 = vadd.f32 %v4710_v53, %v2841_v49  ;;  %v3001_v48 = vadd.f32 %v4716_v31, %v2910_v11 }
 0x1a3   : > { %v2893_v12 = vpop.f32.mrf.mxu1  ;;  %v2968_v42 = vpop.f32.mrf.mxu0 }
 0x1a4   : > { %v2912_v3 = vadd.f32 %v2893_v12, %v2839_v37  ;;  %v2999_v4 = vadd.f32 %v2968_v42, %v2908_v19 }
 0x1a5   : > { %v4711_v27 = vpop.f32.mrf.mxu1  ;;  %v4717_v7 = vpop.f32.mrf.mxu0 }
 0x1a6   : > { %v2915_v40 = vadd.f32 %v4711_v27, %v2842_v15  ;;  %v3002_v56 = vadd.f32 %v4717_v7, %v2911_v61 }
 0x1a7   : > { %v2896_v9 = vpop.f32.mrf.mxu1  ;;  %v2971_v52 = vpop.f32.mrf.mxu0 }
 0x1a8   : > { %v2913_v26 = vadd.f32 %v2896_v9, %v2840_v20  ;;  %v3000_v13 = vadd.f32 %v2971_v52, %v2909_v8 }
 0x1a9   : > { %v4726_v23 = vpop.f32.mrf.mxu1  ;;  %v4720_v0 = vpop.f32.mrf.mxu0 }
 0x1aa   : > { %v3092_v14 = vadd.f32 %v4726_v23, %v3001_v48  ;;  %v3005_v33 = vadd.f32 %v4720_v0, %v2914_v1 }
 0x1ab   : > { %v3059_v32 = vpop.f32.mrf.mxu1  ;;  %v2984_v46 = vpop.f32.mrf.mxu0 }
 0x1ac   : > { %v3090_v35 = vadd.f32 %v3059_v32, %v2999_v4  ;;  %v3003_v11 = vadd.f32 %v2984_v46, %v2912_v3 }
 0x1ad   : > { %v4727_v55 = vpop.f32.mrf.mxu1  ;;  %v4721_v45 = vpop.f32.mrf.mxu0 }
 0x1ae   : > { %v3093_v25 = vadd.f32 %v4727_v55, %v3002_v56  ;;  %v3006_v19 = vadd.f32 %v4721_v45, %v2915_v40 }
 0x1af   : > { %v3062_v39 = vpop.f32.mrf.mxu1  ;;  %v2987_v41 = vpop.f32.mrf.mxu0 }
 0x1b0   : > { %v3091_v49 = vadd.f32 %v3062_v39, %v3000_v13  ;;  %v3004_v61 = vadd.f32 %v2987_v41, %v2913_v26 }
 0x1b1   : > { %v4730_v58 = vpop.f32.mrf.mxu1  ;;  %v4736_v5 = vpop.f32.mrf.mxu0 }
 0x1b2   : > { %v3096_v37 = vadd.f32 %v4730_v58, %v3005_v33  ;;  %v3196_v8 = vadd.f32 %v4736_v5, %v3092_v14 }
 0x1b3   : > { %v3075_v63 = vpop.f32.mrf.mxu1  ;;  %v3163_v22 = vpop.f32.mrf.mxu0 }
 0x1b4   : > { %v3094_v15 = vadd.f32 %v3075_v63, %v3003_v11  ;;  %v6206_v1 = vmax.f32 %v2488_v17, %v3196_v8  ;;  %v3194_v12 = vadd.f32 %v3163_v22, %v3090_v35 }
 0x1b5   : > { %v4731_v53 = vpop.f32.mrf.mxu1  ;;  %v4737_v3 = vpop.f32.mrf.mxu0 }
 0x1b6   : > { %v3097_v20 = vadd.f32 %v4731_v53, %v3006_v19  ;;  %v6211_v27 = vmax.f32 %v2486_v29, %v3194_v12  ;;  %v3197_v42 = vadd.f32 %v4737_v3, %v3093_v25 }
 0x1b7   : > { %v3078_v31 = vpop.f32.mrf.mxu1  ;;  %v3166_v4 = vpop.f32.mrf.mxu0 }
 0x1b8   : > { %v3095_v48 = vadd.f32 %v3078_v31, %v3004_v61  ;;  %v6216_v9 = vmax.f32 %v2489_v50, %v3197_v42  ;;  %v3195_v60 = vadd.f32 %v3166_v4, %v3091_v49 }
 0x1b9   : > { %v4746_v40 = vpop.f32.mrf.mxu1  ;;  %v4740_v17 = vpop.f32.mrf.mxu0 }
 0x1ba   : > { %v6221_v7 = vmax.f32 %v2487_v43, %v3195_v60  ;;  %v3200_v26 = vadd.f32 %v4740_v17, %v3096_v37 }
 0x1bb   : > { %v3244_v59 = vpop.f32.mrf.mxu1  ;;  %v3179_v28 = vpop.f32.mrf.mxu0 }
 0x1bc   : > { %6514 = vst [vmem:[#allocation13_spill] sm:$0xff] %v6221_v7  ;;  %v6226_v29 = vmax.f32 %v2492_v10, %v3200_v26  ;;  %v3198_v56 = vadd.f32 %v3179_v28, %v3094_v15 }
 0x1bd   : > { %v4747_v30 = vpop.f32.mrf.mxu1  ;;  %v4741_v54 = vpop.f32.mrf.mxu0 }
 0x1be   : > { %6515 = vst [vmem:[#allocation6_spill] sm:$0xff] %v6226_v29  ;;  %v6231_v50 = vmax.f32 %v2490_v38, %v3198_v56  ;;  %v3201_v23 = vadd.f32 %v4741_v54, %v3097_v20 }
 0x1bf   : > { %v3247_v36 = vpop.f32.mrf.mxu1  ;;  %v3182_v51 = vpop.f32.mrf.mxu0 }
 0x1c0   : > { %6516 = vst [vmem:[#allocation15_spill] sm:$0xff] %v6231_v50  ;;  %v6236_v43 = vmax.f32 %v2493_v18, %v3201_v23  ;;  %v3199_v52 = vadd.f32 %v3182_v51, %v3095_v48 }
 0x1c1   : > { %v4750_v24 = vpop.f32.mrf.mxu1  ;;  %v4756_v62 = vpop.f32.mrf.mxu0 }
 0x1c2   : > { %6517 = vst [vmem:[#allocation7_spill] sm:$0xff] %v6236_v43  ;;  %v6241_v10 = vmax.f32 %v2491_v34, %v3199_v52  ;;  %v3318_v22 = vadd.f32 %v4756_v62, %v4746_v40 }
 0x1c3   : > { %v3260_v57 = vpop.f32.mrf.mxu1  ;;  %v3309_v2 = vpop.f32.mrf.mxu0 }
 0x1c4   : > { %6518 = vst [vmem:[#allocation16_spill] sm:$0xff] %v6241_v10  ;;  %v3310_v31 = vadd.f32 %v3309_v2, %v3244_v59 }
 0x1c5   : > { %v4751_v14 = vpop.f32.mrf.mxu1  ;;  %v4757_v38 = vpop.f32.mrf.mxu0 }
 0x1c6   : > { %v3321_v4 = vadd.f32 %v4757_v38, %v4747_v30 }
 0x1c7   : > { %v3263_v16 = vpop.f32.mrf.mxu1  ;;  %v3312_v32 = vpop.f32.mrf.mxu0 }
 0x1c8   : > { %v3313_v28 = vadd.f32 %v3312_v32, %v3247_v36 }
 0x1c9   : > { %v4766_v13 = vpop.f32.mrf.mxu1  ;;  %v4760_v35 = vpop.f32.mrf.mxu0 }
 0x1ca   : > { %v3407_v42 = vadd.f32 %v4766_v13, %v3318_v22  ;;  %v3334_v10 = vadd.f32 %v4760_v35, %v4750_v24 }
 0x1cb   : > { %v3374_v0 = vpop.f32.mrf.mxu1  ;;  %v3325_v6 = vpop.f32.mrf.mxu0 }
 0x1cc   : > { %v3405_v26 = vadd.f32 %v3374_v0, %v3310_v31  ;;  %v3326_v43 = vadd.f32 %v3325_v6, %v3260_v57 }
 0x1cd   : > { %v4767_v33 = vpop.f32.mrf.mxu1  ;;  %v4761_v18 = vpop.f32.mrf.mxu0 }
 0x1ce   : > { %v3408_v51 = vadd.f32 %v4767_v33, %v3321_v4  ;;  %v3337_v29 = vadd.f32 %v4761_v18, %v4751_v14 }
 0x1cf   : > { %v3377_v21 = vpop.f32.mrf.mxu1  ;;  %v3328_v46 = vpop.f32.mrf.mxu0 }
 0x1d0   : > { %v3406_v50 = vadd.f32 %v3377_v21, %v3313_v28  ;;  %v3329_v32 = vadd.f32 %v3328_v46, %v3263_v16 }
 0x1d1   : > { %v4770_v55 = vpop.f32.mrf.mxu1  ;;  %v4776_v11 = vpop.f32.mrf.mxu0 }
 0x1d2   : > { %v3480_v56 = vadd.f32 %v4776_v11, %v3407_v42  ;;  %v3411_v0 = vadd.f32 %v4770_v55, %v3334_v10 }
 0x1d3   : > { %v3390_v25 = vpop.f32.mrf.mxu1  ;;  %v3447_v44 = vpop.f32.mrf.mxu0 }
 0x1d4   : > { %v3478_v52 = vadd.f32 %v3447_v44, %v3405_v26  ;;  %v3409_v36 = vadd.f32 %v3390_v25, %v3326_v43 }
 0x1d5   : > { %v4771_v39 = vpop.f32.mrf.mxu1  ;;  %v4777_v34 = vpop.f32.mrf.mxu0 }
 0x1d6   : > { %v3481_v2 = vadd.f32 %v4777_v34, %v3408_v51  ;;  %v3412_v24 = vadd.f32 %v4771_v39, %v3337_v29 }
 0x1d7   : > { %v3393_v47 = vpop.f32.mrf.mxu1  ;;  %v3450_v49 = vpop.f32.mrf.mxu0 }
 0x1d8   : > { %v3479_v38 = vadd.f32 %v3450_v49, %v3406_v50  ;;  %v3410_v18 = vadd.f32 %v3393_v47, %v3329_v32 }
 0x1d9   : > { %v4786_v45 = vpop.f32.mrf.mxu1  ;;  %v4780_v58 = vpop.f32.mrf.mxu0 }
 0x1da   : > { %v3553_v59 = vadd.f32 %v4786_v45, %v3480_v56  ;;  %v3484_v57 = vadd.f32 %v4780_v58, %v3411_v0 }
 0x1db   : > { %v3520_v19 = vpop.f32.mrf.mxu1  ;;  %v3463_v37 = vpop.f32.mrf.mxu0 }
 0x1dc   : > { %v3551_v30 = vadd.f32 %v3520_v19, %v3478_v52  ;;  %v3482_v35 = vadd.f32 %v3463_v37, %v3409_v36 }
 0x1dd   : > { %v4787_v41 = vpop.f32.mrf.mxu1  ;;  %v4781_v63 = vpop.f32.mrf.mxu0 }
 0x1de   : > { %v3554_v33 = vadd.f32 %v4787_v41, %v3481_v2  ;;  %v3485_v42 = vadd.f32 %v4781_v63, %v3412_v24 }
 0x1df   : > { %v3523_v61 = vpop.f32.mrf.mxu1  ;;  %v3466_v15 = vpop.f32.mrf.mxu0 }
 0x1e0   : > { %v3552_v45 = vadd.f32 %v3523_v61, %v3479_v38  ;;  %v3483_v46 = vadd.f32 %v3466_v15, %v3410_v18 }
 0x1e1   : > { %v4790_v5 = vpop.f32.mrf.mxu1  ;;  %v4796_v53 = vpop.f32.mrf.mxu0 }
 0x1e2   : > { %v3626_v22 = vadd.f32 %v4796_v53, %v3553_v59  ;;  %v3557_v16 = vadd.f32 %v4790_v5, %v3484_v57  ;;  %v6249_v5 = vld [vmem:[%s6297_s5] ss:$0 sm:$0xff] }
 0x1e3   : > { %v3536_v8 = vpop.f32.mrf.mxu1  ;;  %v3593_v12 = vpop.f32.mrf.mxu0 }
 0x1e4   : > { %v3624_v44 = vadd.f32 %v3593_v12, %v3551_v30  ;;  %v3555_v55 = vadd.f32 %v3536_v8, %v3482_v35 }
 0x1e5   : > { %v4791_v20 = vpop.f32.mrf.mxu1  ;;  %v4797_v48 = vpop.f32.mrf.mxu0 }
 0x1e6   : > { %v3627_v14 = vadd.f32 %v4797_v48, %v3554_v33  ;;  %v3558_v58 = vadd.f32 %v4791_v20, %v3485_v42 }
 0x1e7   : > { %v6243_v3 = vpop.f32.mrf.mxu1  ;;  %v3596_v17 = vpop.f32.mrf.mxu0 }
 0x1e8   : > { %v3625_v10 = vadd.f32 %v3596_v17, %v3552_v45  ;;  %v3556_v4 = vadd.f32 %v6243_v3, %v3483_v46 }
 0x1e9   : > { %v4806_v60 = vpop.f32.mrf.mxu1  ;;  %v4800_v23 = vpop.f32.mrf.mxu0 }
 0x1ea   : > { %v3699_v34 = vadd.f32 %v4806_v60, %v3626_v22  ;;  %v3630_v37 = vadd.f32 %v4800_v23, %v3557_v16 }
 0x1eb   : > { %v3666_v54 = vpop.f32.mrf.mxu1  ;;  %v3609_v62 = vpop.f32.mrf.mxu0 }
 0x1ec   : > { %v3697_v49 = vadd.f32 %v3666_v54, %v3624_v44  ;;  %v3628_v53 = vadd.f32 %v3609_v62, %v3555_v55  ;;  %v6519_v44 = vld [vmem:[#allocation13_spill] sm:$0xff] }
 0x1ed   : > { %v4807_v40 = vpop.f32.mrf.mxu1  ;;  %v4801_v13 = vpop.f32.mrf.mxu0 }
 0x1ee   : > { %v3700_v29 = vadd.f32 %v4807_v40, %v3627_v14  ;;  %v3631_v60 = vadd.f32 %v4801_v13, %v3558_v58  ;;  %v6520_v14 = vld [vmem:[#allocation6_spill] sm:$0xff] }
 0x1ef   : > { %v3669_v7 = vpop.f32.mrf.mxu1  ;;  %v3612_v31 = vpop.f32.mrf.mxu0 }
 0x1f0   : > { %v3698_v48 = vadd.f32 %v3669_v7, %v3625_v10  ;;  %v3629_v7 = vadd.f32 %v3612_v31, %v3556_v4 }
 0x1f1   : > { %v4810_v11 = vpop.f32.mrf.mxu1  ;;  %v4816_v21 = vpop.f32.mrf.mxu0 }
 0x1f2   : > { %v3772_v43 = vadd.f32 %v4816_v21, %v3699_v34  ;;  %v3703_v28 = vadd.f32 %v4810_v11, %v3630_v37 }
 0x1f3   : > { %v3682_v6 = vpop.f32.mrf.mxu1  ;;  %v3739_v50 = vpop.f32.mrf.mxu0 }
 0x1f4   : > { %v3770_v39 = vadd.f32 %v3739_v50, %v3697_v49  ;;  %v3701_v56 = vadd.f32 %v3682_v6, %v3628_v53  ;;  %v6521_v49 = vld [vmem:[#allocation15_spill] sm:$0xff] }
 0x1f5   : > { %v4811_v19 = vpop.f32.mrf.mxu1  ;;  %v4817_v41 = vpop.f32.mrf.mxu0 }
 0x1f6   : > { %v3773_v63 = vadd.f32 %v4817_v41, %v3700_v29  ;;  %v3704_v40 = vadd.f32 %v4811_v19, %v3631_v60  ;;  %v6522_v41 = vld [vmem:[#allocation7_spill] sm:$0xff] }
 0x1f7   : > { %v3685_v25 = vpop.f32.mrf.mxu1  ;;  %v3742_v12 = vpop.f32.mrf.mxu0 }
 0x1f8   : > { %v3771_v26 = vadd.f32 %v3742_v12, %v3698_v48  ;;  %v3702_v0 = vadd.f32 %v3685_v25, %v3629_v7 }
 0x1f9   : > { %v4826_v61 = vpop.f32.mrf.mxu1  ;;  %v4820_v8 = vpop.f32.mrf.mxu0 }
 0x1fa   : > { %v3876_v47 = vadd.f32 %v4826_v61, %v3772_v43  ;;  %v3776_v59 = vadd.f32 %v4820_v8, %v3703_v28  ;;  %v6523_v61 = vld [vmem:[#allocation16_spill] sm:$0xff] }
 0x1fb   : > { %v3843_v15 = vpop.f32.mrf.mxu1  ;;  %v3755_v23 = vpop.f32.mrf.mxu0 }
 0x1fc   : > { %v3884_v20 = vmax.f32 %v6206_v1, %v3876_v47  ;;  %v3874_v17 = vadd.f32 %v3843_v15, %v3770_v39  ;;  %v3774_v2 = vadd.f32 %v3755_v23, %v3701_v56 }
 0x1fd   : > { %v4827_v54 = vpop.f32.mrf.mxu1  ;;  %v4821_v13 = vpop.f32.mrf.mxu0 }
 0x1fe   : > { %v3899_v3 = vadd.f32 %v6249_v5, %v3884_v20  ;;  %v3882_v51 = vmax.f32 %v6211_v27, %v3874_v17  ;;  %v3877_v52 = vadd.f32 %v4827_v54, %v3773_v63  ;;  %v3777_v36 = vadd.f32 %v4821_v13, %v3704_v40 }
 0x1ff   : > { %v3846_v62 = vpop.f32.mrf.mxu1  ;;  %v3758_v32 = vpop.f32.mrf.mxu0 }
 0x200   : > { %v3907_v30 = vmax.f32 %v3899_v3, 0.0  ;;  %v3897_v1 = vadd.f32 %v6249_v5, %v3882_v51  ;;  %v3885_v38 = vmax.f32 %v6216_v9, %v3877_v52  ;;  %v3875_v22 = vadd.f32 %v3846_v62, %v3771_v26 }
 0x201   : > { %v4830_v27 = vpop.f32.mrf.mxu1  ;;  %v3775_v35 = vadd.f32 %v3758_v32, %v3702_v0 }
 0x202   : > { %v4286_v11 = vpack.c.bf16 %v3907_v30, %v3907_v30  ;;  %v3905_v31 = vmax.f32 %v3897_v1, 0.0  ;;  %v3900_v33 = vadd.f32 %v6249_v5, %v3885_v38  ;;  %v3883_v24 = vmax.f32 %v6519_v44, %v3875_v22 }
 0x203   : > { %v3880_v9 = vadd.f32 %v4830_v27, %v3776_v59  ;;  %v3859_v57 = vpop.f32.mrf.mxu1 }
 0x204   : > { %3948 = vst.msk [vmem:[%s6260_s22 + $0x8] sm:$0xf] %vm3945_vm5, %v4286_v11  ;;  %v4284_v6 = vpack.c.bf16 %v3905_v31, %v3905_v31  ;;  %v3908_v21 = vmax.f32 %v3900_v33, 0.0  ;;  %v3898_v45 = vadd.f32 %v6249_v5, %v3883_v24  ;;  %v3878_v34 = vadd.f32 %v3859_v57, %v3774_v2 }
 0x205   : > { %v3888_v18 = vmax.f32 %v6520_v14, %v3880_v9  ;;  %v4831_v42 = vpop.f32.mrf.mxu1 }
 0x206   : > { %3946 = vst.msk [vmem:[%s6260_s22] sm:$0xf] %vm3945_vm5, %v4284_v6  ;;  %v4287_v19 = vpack.c.bf16 %v3908_v21, %v3908_v21  ;;  %v3906_v50 = vmax.f32 %v3898_v45, 0.0  ;;  %v3886_v10 = vmax.f32 %v6521_v49, %v3878_v34  ;;  %v3881_v43 = vadd.f32 %v4831_v42, %v3777_v36 }
 0x207   : > { %v3903_v16 = vadd.f32 %v6249_v5, %v3888_v18  ;;  %v3862_v55 = vpop.f32.mrf.mxu1 }
 0x208   : > { %3949 = vst.msk [vmem:[%s6260_s22 + $0xc] sm:$0xf] %vm3945_vm5, %v4287_v19  ;;  %v4285_v46 = vpack.c.bf16 %v3906_v50, %v3906_v50  ;;  %v3901_v25 = vadd.f32 %v6249_v5, %v3886_v10  ;;  %v3889_v29 = vmax.f32 %v6522_v41, %v3881_v43  ;;  %v3879_v39 = vadd.f32 %v3862_v55, %v3775_v35 }
 0x209   : > { %v3911_v58 = vmax.f32 %v3903_v16, 0.0 }
 0x20a   : > { %3947 = vst.msk [vmem:[%s6260_s22 + $0x4] sm:$0xf] %vm3945_vm5, %v4285_v46  ;;  %v3909_v37 = vmax.f32 %v3901_v25, 0.0  ;;  %v3904_v53 = vadd.f32 %v6249_v5, %v3889_v29  ;;  %v3887_v12 = vmax.f32 %v6523_v61, %v3879_v39 }
 0x20b   : > { %v4290_v48 = vpack.c.bf16 %v3911_v58, %v3911_v58 }
 0x20c   : > { %v4288_v47 = vpack.c.bf16 %v3909_v37, %v3909_v37  ;;  %v3912_v63 = vmax.f32 %v3904_v53, 0.0  ;;  %v3902_v4 = vadd.f32 %v6249_v5, %v3887_v12 }
 0x20d   : > { %3952 = vst.msk [vmem:[%s6260_s22 + $0x18] sm:$0xf] %vm3945_vm5, %v4290_v48 }
 0x20e   : > { %3950 = vst.msk [vmem:[%s6260_s22 + $0x10] sm:$0xf] %vm3945_vm5, %v4288_v47  ;;  %v4291_v60 = vpack.c.bf16 %v3912_v63, %v3912_v63  ;;  %v3910_v15 = vmax.f32 %v3902_v4, 0.0 }
 0x210   : > { %3953 = vst.msk [vmem:[%s6260_s22 + $0x1c] sm:$0xf] %vm3945_vm5, %v4291_v60  ;;  %v4289_v8 = vpack.c.bf16 %v3910_v15, %v3910_v15 }
 0x212   : > { %3951 = vst.msk [vmem:[%s6260_s22 + $0x14] sm:$0xf] %vm3945_vm5, %v4289_v8 }
 0x213 PF: > { %s16_s21 = sadd.s32 1, %s4924_s21  }
 0x214   : > { %p13_p4 = scmp.ge.s32.totalorder %s16_s21, 4  }
 0x216   :  { %15 = sbr.rel (!%p13_p4) target bundleno = 1 (0x1), region = 91 }

</bundles_post_ra>
